<compile_context>
chip_gen: v6e
topology: v6e:2x2x1
jax: 0.10.0
libtpu: 0.0.40
codegen_flags: <defaults>
</compile_context>

<pallas_src>
import functools

import jax
import jax.numpy as jnp
from jax.experimental import pallas as pl
from jax.experimental.pallas import tpu as pltpu


def _aggr_sum_kernel(neis_ref, h_ref, out_ref, acc_ref, *, precision):
    """One (s-tile, e-tile) step: acc += onehot(X_neis_tile) @ H_tile."""
    e = pl.program_id(1)

    # Zero the f32 accumulator at the start of each edge reduction.
    @pl.when(e == 0)
    def _():
        acc_ref[...] = jnp.zeros_like(acc_ref)

    v_pad = acc_ref.shape[0]

    # One-hot mask via broadcast: neis (1, te) vs node ids (v_pad, 1).
    # Raw index values are compared against 0..V-1, exactly as in the PyTorch
    # module; anything outside [0, V) (incl. the -1 padding sentinel) matches
    # nothing.
    iota_v = jax.lax.broadcasted_iota(jnp.int32, (v_pad, 1), 0)
    mask = (neis_ref[...] == iota_v).astype(h_ref.dtype)          # (v_pad, te)

    acc_ref[...] += jnp.dot(mask, h_ref[...],
                            preferred_element_type=jnp.float32,
                            precision=precision)

    # Single lane-dense writeback in the output dtype on the last edge tile.
    @pl.when(e == pl.num_programs(1) - 1)
    def _():
        out_ref[...] = acc_ref[...].astype(out_ref.dtype)


def _round_up(x, m):
    return ((x + m - 1) // m) * m


def _vmem_estimate(v_pad, ts, te, in_bytes, out_bytes):
    """Rough per-core VMEM working set for the chosen tiling (bytes)."""
    neis_b = 2 * 8 * te * 4                 # (1, te) index tile, sublane-padded, 2 bufs
    h_b = 2 * te * ts * in_bytes            # double-buffered H tile
    out_b = 2 * v_pad * ts * out_bytes      # output block
    acc_b = v_pad * ts * 4                  # f32 accumulator scratch
    mask_b = v_pad * te * 4                 # one-hot compare temporaries
    return neis_b + h_b + out_b + acc_b + mask_b


@functools.partial(jax.jit, static_argnames=("V", "edge_tile", "feat_tile"))
def aggr_sum(H, X_neis, V, *, edge_tile=None, feat_tile=None):
    """Pallas TPU AggrSum.forward: (E, S) edge messages -> (V, S) node sums."""
    E, S = H.shape
    in_bytes = jnp.dtype(H.dtype).itemsize
    out_bytes = in_bytes

    v_pad = _round_up(V, 8)

    # ---- tile selection (large tiles, shrunk to a v7x-safe VMEM budget) ----
    if feat_tile is not None:
        ts = _round_up(feat_tile, 128)
    else:
        s_align = _round_up(max(S, 1), 128)
        ts = s_align if s_align <= 1024 else 512

    if edge_tile is not None:
        te = _round_up(edge_tile, 128)
    else:
        e_align = _round_up(max(E, 1), 256)      # K multiple of 256 for v6e/v7x MXU
        te = e_align if e_align <= 4096 else 1024

    BUDGET = 48 << 20                            # target per-core working set
    while _vmem_estimate(v_pad, ts, te, in_bytes, out_bytes) > BUDGET and te > 256:
        te = max(256, te // 2)
    while _vmem_estimate(v_pad, ts, te, in_bytes, out_bytes) > BUDGET and ts > 128:
        ts = max(128, ts // 2)
    # TODO(synk): tile the V axis (replay edge tiles per V block) if
    # v_pad * ts * 4 alone exceeds the per-core VMEM budget (very large graphs).

    e_pad = _round_up(max(E, 1), te)
    s_pad = _round_up(max(S, 1), ts)

    # ---- pad inputs: indices always (tiny), H only when ragged -------------
    neis = jnp.full((1, e_pad), -1, dtype=jnp.int32)
    neis = neis.at[0, :E].set(X_neis.astype(jnp.int32))

    if E == e_pad and S == s_pad:
        h = H                                    # no extra HBM round-trip
    else:
        h = jnp.zeros((e_pad, s_pad), dtype=H.dtype).at[:E, :S].set(H)

    precision = (jax.lax.Precision.HIGHEST
                 if H.dtype == jnp.float32 else None)

    est = _vmem_estimate(v_pad, ts, te, in_bytes, out_bytes)
    vmem_limit = int(min(max(2 * est, 32 << 20), 56 << 20))

    kernel = functools.partial(_aggr_sum_kernel, precision=precision)

    out = pl.pallas_call(
        kernel,
        out_shape=jax.ShapeDtypeStruct((v_pad, s_pad), H.dtype),
        grid_spec=pltpu.PrefetchScalarGridSpec(
            num_scalar_prefetch=0,
            grid=(s_pad // ts, e_pad // te),
            in_specs=[
                pl.BlockSpec((1, te), lambda s, e: (0, e)),     # X_neis tile
                pl.BlockSpec((te, ts), lambda s, e: (e, s)),    # H tile
            ],
            out_specs=pl.BlockSpec((v_pad, ts), lambda s, e: (0, s)),
            scratch_shapes=[pltpu.VMEM((v_pad, ts), jnp.float32)],
        ),
        compiler_params=pltpu.CompilerParams(
            dimension_semantics=("parallel", "arbitrary"),   # S parallel, E reduction
            vmem_limit_bytes=vmem_limit,
        ),
    )(neis, h)

    return out[:V, :S]


def aggr_sum_ref(H, X_neis, V):
    """Exact-f32 pure-JAX reference (segment scatter-add)."""
    idx = X_neis.astype(jnp.int32)
    valid = (idx >= 0) & (idx < V)
    safe = jnp.where(valid, idx, 0)
    contrib = jnp.where(valid[:, None], H, 0).astype(jnp.float32)
    out = jnp.zeros((V, H.shape[1]), jnp.float32).at[safe].add(contrib)
    return out.astype(H.dtype)


if __name__ == "__main__":
    key = jax.random.PRNGKey(0)
    k_h, k_idx, k_h2, k_idx2 = jax.random.split(key, 4)

    # Case 1: small, deliberately non-aligned shapes (E edges, S features,
    # V nodes) — exercises every padding path; runs as a single MXU step.
    E, S, V = 300, 100, 70
    H = jax.random.normal(k_h, (E, S), dtype=jnp.float32)
    X_neis = jax.random.randint(k_idx, (E,), 0, V).astype(jnp.int32)

    out = aggr_sum(H, X_neis, V)
    jax.block_until_ready(out)
    ref = aggr_sum_ref(H, X_neis, V)
    assert out.shape == (V, S) and out.dtype == H.dtype
    assert jnp.allclose(out, ref, atol=1e-5, rtol=1e-5), float(
        jnp.max(jnp.abs(out - ref)))

    # Case 2: force multiple edge tiles (accumulator init/finalize) and
    # multiple feature tiles (parallel S axis) via explicit tile overrides.
    E2, S2, V2 = 700, 300, 50
    H2 = jax.random.normal(k_h2, (E2, S2), dtype=jnp.float32)
    X2 = jax.random.randint(k_idx2, (E2,), 0, V2).astype(jnp.int32)

    out2 = aggr_sum(H2, X2, V2, edge_tile=256, feat_tile=128)
    jax.block_until_ready(out2)
    ref2 = aggr_sum_ref(H2, X2, V2)
    assert out2.shape == (V2, S2)
    assert jnp.allclose(out2, ref2, atol=1e-5, rtol=1e-5), float(
        jnp.max(jnp.abs(out2 - ref2)))

    print("KERNEL_OK")
</pallas_src>

<mosaic_0001>
module attributes {stable_mosaic.version = 11 : i64} {
  func.func @_aggr_sum_kernel(%arg0: i32, %arg1: i32, %arg2: memref<1x512xi32, #tpu.memory_space<vmem>>, %arg3: memref<512x128xf32, #tpu.memory_space<vmem>>, %arg4: memref<72x128xf32, #tpu.memory_space<vmem>>, %arg5: memref<72x128xf32, #tpu.memory_space<vmem>>) attributes {dimension_semantics = [#tpu.dimension_semantics<parallel>, #tpu.dimension_semantics<arbitrary>], iteration_bounds = array<i64: 1, 1>, scalar_prefetch = 0 : i64, scratch_operands = 1 : i64, tpu.core_type = #tpu.core_type<tc>, window_params = [{transform_indices = @transform_0, window_bounds = array<i64: 1, 512>}, {transform_indices = @transform_1, window_bounds = array<i64: 512, 128>}, {transform_indices = @transform_2, window_bounds = array<i64: 72, 128>}]} {
    %c0_i32 = arith.constant 0 : i32
    %0 = arith.cmpi eq, %arg1, %c0_i32 : i32
    %1 = arith.extui %0 : i1 to i32
    %c0_i32_0 = arith.constant 0 : i32
    %2 = arith.cmpi ne, %1, %c0_i32_0 : i32
    scf.if %2 {
      %cst_10 = arith.constant 0.000000e+00 : f32
      %18 = vector.broadcast %cst_10 : f32 to vector<72x128xf32>
      %c0_11 = arith.constant 0 : index
      %c0_12 = arith.constant 0 : index
      %19 = vector.load %arg5[%c0_11, %c0_12] : memref<72x128xf32, #tpu.memory_space<vmem>>, vector<72x128xf32>
      tpu.vector_store %arg5[%c0_11, %c0_12], %18 {strides = array<i32>} : memref<72x128xf32, #tpu.memory_space<vmem>>, vector<72x128xf32>,
    } else {
    }
    %3 = tpu.iota {dimensions = array<i32: 0>} : vector<72x1xi32>
    %c0 = arith.constant 0 : index
    %c0_1 = arith.constant 0 : index
    %4 = vector.load %arg2[%c0, %c0_1] : memref<1x512xi32, #tpu.memory_space<vmem>>, vector<1x512xi32>
    %5 = vector.broadcast %4 : vector<1x512xi32> to vector<72x512xi32>
    %6 = vector.broadcast %3 : vector<72x1xi32> to vector<72x512xi32>
    %7 = arith.cmpi eq, %5, %6 : vector<72x512xi32>
    %8 = arith.extui %7 : vector<72x512xi1> to vector<72x512xi32>
    %9 = arith.sitofp %8 : vector<72x512xi32> to vector<72x512xf32>
    %c0_2 = arith.constant 0 : index
    %c0_3 = arith.constant 0 : index
    %10 = vector.load %arg5[%c0_2, %c0_3] : memref<72x128xf32, #tpu.memory_space<vmem>>, vector<72x128xf32>
    %c0_4 = arith.constant 0 : index
    %c0_5 = arith.constant 0 : index
    %11 = vector.load %arg3[%c0_4, %c0_5] : memref<512x128xf32, #tpu.memory_space<vmem>>, vector<512x128xf32>
    %cst = arith.constant dense<0.000000e+00> : vector<72x128xf32>
    %12 = tpu.matmul %9, %11, %cst {dimension_numbers = #tpu.dot_dimension_numbers<[1], [0], [0], [1], [0, 0, 1, 1], [], []>, precision = #tpu.contract_precision<fp32>} : vector<72x512xf32>, vector<512x128xf32>, vector<72x128xf32> -> vector<72x128xf32>
    %13 = arith.addf %10, %12 : vector<72x128xf32>
    %c0_6 = arith.constant 0 : index
    %c0_7 = arith.constant 0 : index
    %14 = vector.load %arg5[%c0_6, %c0_7] : memref<72x128xf32, #tpu.memory_space<vmem>>, vector<72x128xf32>
    tpu.vector_store %arg5[%c0_6, %c0_7], %13 {strides = array<i32>} : memref<72x128xf32, #tpu.memory_space<vmem>>, vector<72x128xf32>,
    %c0_i32_8 = arith.constant 0 : i32
    %15 = arith.cmpi eq, %arg1, %c0_i32_8 : i32
    %16 = arith.extui %15 : i1 to i32
    %c0_i32_9 = arith.constant 0 : i32
    %17 = arith.cmpi ne, %16, %c0_i32_9 : i32
    scf.if %17 {
      %c0_10 = arith.constant 0 : index
      %c0_11 = arith.constant 0 : index
      %18 = vector.load %arg5[%c0_10, %c0_11] : memref<72x128xf32, #tpu.memory_space<vmem>>, vector<72x128xf32>
      %c0_12 = arith.constant 0 : index
      %c0_13 = arith.constant 0 : index
      %19 = vector.load %arg4[%c0_12, %c0_13] : memref<72x128xf32, #tpu.memory_space<vmem>>, vector<72x128xf32>
      tpu.vector_store %arg4[%c0_12, %c0_13], %18 {strides = array<i32>} : memref<72x128xf32, #tpu.memory_space<vmem>>, vector<72x128xf32>,
    } else {
    }
    return
  }
  func.func @transform_0(%arg0: i32, %arg1: i32) -> (i32, i32) {
    %c0_i32 = arith.constant 0 : i32
    %c0_i32_0 = arith.constant 0 : i32
    return %c0_i32, %arg1 : i32, i32
  }
  func.func @transform_1(%arg0: i32, %arg1: i32) -> (i32, i32) {
    %c0_i32 = arith.constant 0 : i32
    return %arg1, %arg0 : i32, i32
  }
  func.func @transform_2(%arg0: i32, %arg1: i32) -> (i32, i32) {
    %c0_i32 = arith.constant 0 : i32
    %c0_i32_0 = arith.constant 0 : i32
    return %c0_i32, %arg0 : i32, i32
  }
}

</mosaic_0001>

<bundles_post_ra>
// kernel: aggr_sum.1
= control target key start
LH: loop header
LB: loop body
LE: loop exit
PB: predicated region body
PF: predicated region fallthrough
CT: control target
= control target key end

     0   :  { %s6235_s0 = inlined_call_operand.vmem [shape: s32[1,512], index: 0, kind: input, shape index: {}]   ;;  %s6236_s1 = inlined_call_operand.vmem [shape: f32[512,128], index: 1, kind: input, shape index: {}]   ;;  %s6237_s2 = inlined_call_operand.hbm [shape: f32[72,128], index: 2, kind: output, shape index: {}]  }
   0x1   :  { %v200_v0 = vld [vmem:[%s6236_s1 + $0xf8] sm:$0xff]  ;;  %v199_v2 = vld [vmem:[%s6236_s1 + $0xf0] sm:$0xff]  ;;  %v198_v7 = vld [vmem:[%s6236_s1 + $0xe8] sm:$0xff] }
   0x2   :  { %v184_v1 = vld [vmem:[%s6236_s1 + $0x78] sm:$0xff]  ;;  %v3817_v3 = vand.u32 4294901760, %v200_v0  ;;  %v3821_v5 = vand.u32 4294901760, %v199_v2  ;;  %v183_v6 = vld [vmem:[%s6236_s1 + $0x70] sm:$0xff]  ;;  %v182_v8 = vld [vmem:[%s6236_s1 + $0x68] sm:$0xff]  ;;  %v3834_v10 = vand.u32 4294901760, %v198_v7 }
   0x3   :  { %v3819_v4 = vand.u32 4294901760, %v184_v1  ;;  %v3832_v9 = vand.u32 4294901760, %v183_v6  ;;  %v3836_v11 = vand.u32 4294901760, %v182_v8  ;;  %v197_v12 = vld [vmem:[%s6236_s1 + $0xe0] sm:$0xff]  ;;  %v3847_v14 = vld [vmem:[%s6236_s1 + $0xd8] sm:$0xff]  ;;  %v3868_v21 = vld [vmem:[%s6236_s1 + $0xd0] sm:$0xff] }
   0x4   :  { %6527 = vst [vmem:[#allocation6_spill] sm:$0xff] %v3817_v3  ;;  %v181_v13 = vld [vmem:[%s6236_s1 + $0x60] sm:$0xff]  ;;  %3052 = vmatprep.subr.mxu0 %v3817_v3  ;;  %v3850_v16 = vand.u32 4294901760, %v197_v12  ;;  %v3855_v18 = vand.u32 4294901760, %v3847_v14  ;;  %v3858_v19 = vsub.f32 %v200_v0, %v3817_v3  ;;  %v3863_v20 = vld [vmem:[%s6236_s1 + $0x58] sm:$0xff]  ;;  %v3873_v22 = vld [vmem:[%s6236_s1 + $0x50] sm:$0xff]  ;;  %v3886_v26 = vsub.f32 %v199_v2, %v3821_v5 }
   0x5   :  { %6528 = vst [vmem:[#allocation7_spill] sm:$0xff] %v3819_v4  ;;  %v3852_v17 = vand.u32 4294901760, %v181_v13  ;;  %3053 = vmatpush3.msra.mxu0 %v3819_v4  ;;  %v3877_v23 = vand.u32 4294901760, %v3863_v20  ;;  %v3880_v24 = vsub.f32 %v184_v1, %v3819_v4  ;;  %v3883_v25 = vand.u32 4294901760, %v3868_v21  ;;  %v3891_v27 = vld [vmem:[%s6236_s1 + $0xc8] sm:$0xff]  ;;  %v3901_v29 = vld [vmem:[%s6236_s1 + $0xc0] sm:$0xff] }
   0x6   :  { %6529 = vst [vmem:[#allocation8_spill] sm:$0xff] %v3858_v19  ;;  %v3896_v28 = vld [vmem:[%s6236_s1 + $0x48] sm:$0xff]  ;;  %3054 = vmatprep.subr.mxu0 %v3821_v5  ;;  %v6251_v30 = vand.u32 4294901760, %v3858_v19  ;;  %v3906_v31 = vand.u32 4294901760, %v3873_v22  ;;  %v3909_v32 = vsub.f32 %v183_v6, %v3832_v9  ;;  %v3912_v33 = vand.u32 4294901760, %v3891_v27  ;;  %v3926_v38 = vld [vmem:[%s6236_s1 + $0x40] sm:$0xff] }
   0x7   :  { %3055 = vmatpush3.msra.mxu0 %v3832_v9  ;;  %v6249_v34 = vand.u32 4294901760, %v3880_v24  ;;  %v6248_v35 = vand.u32 4294901760, %v3886_v26  ;;  %v3918_v36 = vsub.f32 %v198_v7, %v3834_v10  ;;  %v3921_v37 = vand.u32 4294901760, %v3896_v28  ;;  %v3953_v47 = vld [vmem:[%s6236_s1 + $0xb8] sm:$0xff]  ;;  %v3976_v57 = vld [vmem:[%s6236_s1 + $0xb0] sm:$0xff] }
   0x8   :  { %6530 = vst [vmem:[#allocation9_spill] sm:$0xff] %v3906_v31  ;;  %6531 = vst [vmem:[#allocation10_spill] sm:$0xff] %v3912_v33  ;;  %3056 = vmatprep.subr.mxu0 %v3834_v10  ;;  %v581_v39 = vsub.f32 %v3858_v19, %v6251_v30  ;;  %v6246_v40 = vand.u32 4294901760, %v3909_v32  ;;  %v3934_v41 = vsub.f32 %v182_v8, %v3836_v11  ;;  %v3937_v42 = vand.u32 4294901760, %v3901_v29  ;;  %v3966_v52 = vld [vmem:[%s6236_s1 + $0x38] sm:$0xff]  ;;  %v3991_v62 = vld [vmem:[%s6236_s1 + $0x30] sm:$0xff] }
   0x9   :  { %6532 = vst [vmem:[#allocation11_spill] sm:$0xff] %v3918_v36  ;;  %6533 = vst [vmem:[#allocation12_spill] sm:$0xff] %v3921_v37  ;;  %3057 = vmatpush3.msra.mxu0 %v3836_v11  ;;  %v469_v43 = vsub.f32 %v3880_v24, %v6249_v34  ;;  %v588_v44 = vsub.f32 %v3886_v26, %v6248_v35  ;;  %v6244_v45 = vand.u32 4294901760, %v3918_v36  ;;  %v3961_v51 = vand.u32 4294901760, %v3926_v38 }
   0xa   :  { %6534 = vst [vmem:[#allocation13_spill] sm:$0xff] %v3934_v41  ;;  %6535 = vst [vmem:[#allocation14_spill] sm:$0xff] %v3937_v42  ;;  %v3948_v46 = vsub.f32 %v197_v12, %v3850_v16  ;;  %3058 = vmatprep.subr.mxu0 %v3850_v16  ;;  %v582_v48 = vand.u32 4294901760, %v581_v39  ;;  %v476_v49 = vsub.f32 %v3909_v32, %v6246_v40  ;;  %v6243_v50 = vand.u32 4294901760, %v3934_v41 }
   0xb   :  { %6537 = vst [vmem:[#allocation16_spill] sm:$0xff] %v3961_v51  ;;  %3059 = vmatpush3.msra.mxu0 %v3852_v17  ;;  %v470_v53 = vand.u32 4294901760, %v469_v43  ;;  %v589_v54 = vand.u32 4294901760, %v588_v44  ;;  %v595_v55 = vsub.f32 %v3918_v36, %v6244_v45  ;;  %v3983_v60 = vsub.f32 %v181_v13, %v3852_v17 }
   0xc   :  { %6536 = vst [vmem:[#allocation15_spill] sm:$0xff] %v3948_v46  ;;  %v6241_v56 = vand.u32 4294901760, %v3948_v46  ;;  %3060 = vmatprep.subr.mxu0 %v3855_v18  ;;  %3111 = vmatprep.subr.mxu1 %v582_v48  ;;  %v477_v58 = vand.u32 4294901760, %v476_v49  ;;  %v483_v59 = vsub.f32 %v3934_v41, %v6243_v50  ;;  %v3986_v61 = vand.u32 4294901760, %v3953_v47 }
   0xd   :  { %6538 = vst [vmem:[#allocation17_spill] sm:$0xff] %v3983_v60 }
   0xe   :  { %6539 = vst [vmem:[#allocation18_spill] sm:$0xff] %v3986_v61 }
   0xf   :  { %7 = vsyncpa [#allocation4], 0  ;;  %3061 = vmatpush3.msra.mxu0 %v3877_v23  ;;  %3112 = vmatpush3.msra.mxu1 %v470_v53  ;;  %v596_v63 = vand.u32 4294901760, %v595_v55  ;;  %v602_v0 = vsub.f32 %v3948_v46, %v6241_v56  ;;  %v3999_v1 = vsub.f32 %v3847_v14, %v3855_v18  ;;  %v4002_v2 = vand.u32 4294901760, %v3966_v52  ;;  %v4007_v6 = vld [vmem:[%s6236_s1 + $0xa8] sm:$0xff]  ;;  %v4100_v45 = vld [vmem:[%s6236_s1 + $0x18] sm:$0xff] }
  0x10   :  { %3062 = vmatprep.subr.mxu0 %v3883_v25  ;;  %3113 = vmatprep.subr.mxu1 %v589_v54  ;;  %v484_v7 = vand.u32 4294901760, %v483_v59  ;;  %v6239_v8 = vand.u32 4294901760, %v3983_v60  ;;  %v4013_v12 = vsub.f32 %v3863_v20, %v3877_v23  ;;  %v4016_v13 = vand.u32 4294901760, %v3976_v57  ;;  %v4021_v14 = vld [vmem:[%s6236_s1 + $0x28] sm:$0xff]  ;;  %v4116_v40 = vld [vmem:[%s6236_s1 + $0x90] sm:$0xff] }
  0x11   :  { %6540 = vst [vmem:[#allocation19_spill] sm:$0xff] %v3999_v1  ;;  %6541 = vst [vmem:[#allocation20_spill] sm:$0xff] %v4002_v2  ;;  %3063 = vmatpush3.msra.mxu0 %v3906_v31  ;;  %3114 = vmatpush3.msra.mxu1 %v477_v58  ;;  %v603_v39 = vand.u32 4294901760, %v602_v0  ;;  %v6238_v43 = vand.u32 4294901760, %v3999_v1  ;;  %v4027_v44 = vsub.f32 %v3868_v21, %v3883_v25  ;;  %v4030_v20 = vand.u32 4294901760, %v3991_v62  ;;  %v4047_v21 = vld [vmem:[%s6236_s1 + $0xa0] sm:$0xff] }
  0x12   :  { %6542 = vst [vmem:[#allocation21_spill] sm:$0xff] %v4016_v13  ;;  %3064 = vmatprep.subr.mxu0 %v3912_v33  ;;  %3115 = vmatprep.subr.mxu1 %v596_v63  ;;  %v490_v48 = vsub.f32 %v3983_v60, %v6239_v8  ;;  %v6240_v49 = vand.u32 4294901760, %v4013_v12  ;;  %v4039_v53 = vsub.f32 %v3873_v22, %v3906_v31  ;;  %v4042_v54 = vand.u32 4294901760, %v4007_v6  ;;  %v4143_v30 = vld [vmem:[%s6236_s1 + $0x88] sm:$0xff] }
  0x13   :  { %6543 = vst [vmem:[#allocation22_spill] sm:$0xff] %v4030_v20  ;;  %3065 = vmatpush3.msra.mxu0 %v3921_v37  ;;  %3116 = vmatpush3.msra.mxu1 %v484_v7  ;;  %v609_v55 = vsub.f32 %v3999_v1, %v6238_v43  ;;  %v6242_v58 = vand.u32 4294901760, %v4027_v44  ;;  %v4056_v22 = vsub.f32 %v3891_v27, %v3912_v33  ;;  %v4059_v59 = vand.u32 4294901760, %v4021_v14  ;;  %v4073_v27 = vld [vmem:[%s6236_s1 + $0x20] sm:$0xff] }
  0x14   :  { %6544 = vst [vmem:[#allocation23_spill] sm:$0xff] %v4042_v54  ;;  %3066 = vmatprep.subr.mxu0 %v3937_v42  ;;  %3117 = vmatprep.subr.mxu1 %v603_v39  ;;  %v491_v63 = vand.u32 4294901760, %v490_v48  ;;  %v497_v0 = vsub.f32 %v4013_v12, %v6240_v49  ;;  %v6245_v7 = vand.u32 4294901760, %v4039_v53  ;;  %v4068_v43 = vsub.f32 %v3896_v28, %v3921_v37  ;;  %v4086_v28 = vld [vmem:[%s6236_s1 + $0x98] sm:$0xff] }
  0x15   :  { %6545 = vst [vmem:[#allocation24_spill] sm:$0xff] %v4059_v59  ;;  %3067 = vmatpush3.msra.mxu0 %v3961_v51  ;;  %v610_v8 = vand.u32 4294901760, %v609_v55  ;;  %v616_v39 = vsub.f32 %v4027_v44, %v6242_v58  ;;  %v6247_v48 = vand.u32 4294901760, %v4056_v22  ;;  %v4081_v49 = vand.u32 4294901760, %v4047_v21 }
  0x16   :  { %3118 = vmatpush3.msra.mxu1 %v491_v63  ;;  %3068 = vmatprep.subr.mxu0 %v3986_v61  ;;  %v498_v56 = vand.u32 4294901760, %v497_v0  ;;  %v504_v55 = vsub.f32 %v4039_v53, %v6245_v7  ;;  %v6250_v58 = vand.u32 4294901760, %v4068_v43  ;;  %v4095_v50 = vsub.f32 %v3901_v29, %v3937_v42 }
  0x17   :  { %6546 = vst [vmem:[#allocation25_spill] sm:$0xff] %v4081_v49  ;;  %3119 = vmatprep.subr.mxu1 %v610_v8  ;;  %3069 = vmatpush3.msra.mxu0 %v4002_v2  ;;  %v617_v63 = vand.u32 4294901760, %v616_v39  ;;  %v623_v0 = vsub.f32 %v4056_v22, %v6247_v48  ;;  %v4107_v7 = vand.u32 4294901760, %v4073_v27  ;;  %v4111_v29 = vsub.f32 %v3926_v38, %v3961_v51  ;;  %v4129_v38 = vld [vmem:[%s6236_s1 + $0x10] sm:$0xff] }
  0x18   :  { %3120 = vmatpush3.msra.mxu1 %v498_v56  ;;  %3070 = vmatprep.subr.mxu0 %v4016_v13  ;;  %v505_v8 = vand.u32 4294901760, %v504_v55  ;;  %v511_v39 = vsub.f32 %v4068_v43, %v6250_v58  ;;  %v6254_v48 = vand.u32 4294901760, %v4095_v50  ;;  %v4124_v35 = vand.u32 4294901760, %v4086_v28 }
  0x19   :  { %6547 = vst [vmem:[#allocation26_spill] sm:$0xff] %v4107_v7  ;;  %3121 = vmatprep.subr.mxu1 %v617_v63  ;;  %3071 = vmatpush3.msra.mxu0 %v4030_v20  ;;  %v624_v56 = vand.u32 4294901760, %v623_v0  ;;  %v6255_v55 = vand.u32 4294901760, %v4111_v29  ;;  %v4135_v34 = vsub.f32 %v3953_v47, %v3986_v61  ;;  %v4138_v58 = vand.u32 4294901760, %v4100_v45 }
  0x1a   :  { %6548 = vst [vmem:[#allocation27_spill] sm:$0xff] %v4124_v35  ;;  %3122 = vmatpush3.msra.mxu1 %v505_v8  ;;  %3072 = vmatprep.subr.mxu0 %v4042_v54  ;;  %v512_v63 = vand.u32 4294901760, %v511_v39  ;;  %v630_v0 = vsub.f32 %v4095_v50, %v6254_v48  ;;  %v4151_v47 = vsub.f32 %v3966_v52, %v4002_v2  ;;  %v4154_v15 = vand.u32 4294901760, %v4116_v40  ;;  %v4171_v52 = vld [vmem:[%s6236_s1 + $0x8] sm:$0xff] }
  0x1b   :  { %6549 = vst [vmem:[#allocation28_spill] sm:$0xff] %v4138_v58  ;;  %3123 = vmatprep.subr.mxu1 %v624_v56  ;;  %3073 = vmatpush3.msra.mxu0 %v4059_v59  ;;  %v518_v8 = vsub.f32 %v4111_v29, %v6255_v55  ;;  %v4163_v61 = vsub.f32 %v3976_v57, %v4016_v13  ;;  %v4166_v48 = vand.u32 4294901760, %v4129_v38  ;;  %v4180_v57 = vand.u32 4294901760, %v4143_v30  ;;  %v4185_v13 = vld [vmem:[%s6236_s1 + $0x80] sm:$0xff] }
  0x1c   :  { %6550 = vst [vmem:[#allocation29_spill] sm:$0xff] %v4151_v47  ;;  %6551 = vst [vmem:[#allocation30_spill] sm:$0xff] %v4154_v15  ;;  %3124 = vmatpush3.msra.mxu1 %v512_v63  ;;  %3074 = vmatprep.subr.mxu0 %v4081_v49  ;;  %v631_v56 = vand.u32 4294901760, %v630_v0  ;;  %v4177_v39 = vsub.f32 %v3991_v62, %v4030_v20  ;;  %v6555_v2 = vand.u32 4294901760, %v4135_v34  ;;  %v6556_v20 = vand.u32 4294901760, %v4151_v47 }
  0x1d   :  { %6552 = vst [vmem:[#allocation31_spill] sm:$0xff] %v4163_v61  ;;  %6553 = vst [vmem:[#allocation32_spill] sm:$0xff] %v4166_v48  ;;  %3075 = vmatpush3.msra.mxu0 %v4107_v7  ;;  %v519_v63 = vand.u32 4294901760, %v518_v8  ;;  %v6272_v55 = vand.u32 4294901760, %v4163_v61  ;;  %v4194_v62 = vsub.f32 %v4007_v6, %v4042_v54  ;;  %v4202_v8 = vand.u32 4294901760, %v4171_v52  ;;  %v4211_v6 = vld [vmem:[%s6236_s1] sm:$0xff] }
  0x1e   :  { %6554 = vst [vmem:[#allocation33_spill] sm:$0xff] %v4180_v57  ;;  %v637_v0 = vsub.f32 %v4135_v34, %v6555_v2  ;;  %3125 = vmatprep.subr.mxu1 %v631_v56  ;;  %3076 = vmatprep.subr.mxu0 %v4124_v35  ;;  %v525_v51 = vsub.f32 %v4151_v47, %v6556_v20  ;;  %v4219_v54 = vand.u32 4294901760, %v4185_v13  ;;  %v4235_v33 = vand.u32 4294901760, %v4211_v6 }
  0x1f   :  { %v4206_v2 = vsub.f32 %v4021_v14, %v4059_v59  ;;  %3126 = vmatpush3.msra.mxu1 %v519_v63  ;;  %3077 = vmatpush3.msra.mxu0 %v4138_v58  ;;  %v644_v20 = vsub.f32 %v4163_v61, %v6272_v55  ;;  %v6279_v42 = vand.u32 4294901760, %v4194_v62  ;;  %v6559_v59 = vand.u32 4294901760, %v4177_v39 }
  0x20   :  { %v638_v56 = vand.u32 4294901760, %v637_v0  ;;  %6558 = vst [vmem:[#allocation35_spill] sm:$0xff] %v4219_v54  ;;  %v526_v14 = vand.u32 4294901760, %v525_v51  ;;  %3078 = vmatprep.subr.mxu0 %v4154_v15  ;;  %v4228_v0 = vsub.f32 %v4047_v21, %v4081_v49  ;;  %6561 = vst [vmem:[#allocation37_spill] sm:$0xff] %v4235_v33  ;;  %v6562_v61 = vlaneseq }
  0x21   :  { %6557 = vst [vmem:[#allocation34_spill] sm:$0xff] %v4206_v2  ;;  %v532_v37 = vsub.f32 %v4177_v39, %v6559_v59  ;;  %v6280_v63 = vand.u32 4294901760, %v4206_v2  ;;  %v645_v55 = vand.u32 4294901760, %v644_v20  ;;  %3079 = vmatpush3.msra.mxu0 %v4166_v48  ;;  %v651_v51 = vsub.f32 %v4194_v62, %v6279_v42  ;;  %v4248_v20 = vld [vmem:[%s6235_s0] sm:$0xf] }
  0x22   :  { %6560 = vst [vmem:[#allocation36_spill] sm:$0xff] %v4228_v0  ;;  %3127 = vmatprep.subr.mxu1 %v638_v56  ;;  %v4238_v31 = vshrl.u32 %v6562_v61, 7  ;;  %3080 = vmatprep.subr.mxu0 %v4180_v57  ;;  %v6285_v56 = vand.u32 4294901760, %v4228_v0  ;;  %6564 = vst [vmem:[#allocation39_spill] sm:$0xff] %v4248_v20  ;;  %v4252_v42 = vsub.f32 %v4073_v27, %v4107_v7 }
  0x23   :  { %3128 = vmatpush3.msra.mxu1 %v526_v14  ;;  %v533_v59 = vand.u32 4294901760, %v532_v37  ;;  %v539_v21 = vsub.f32 %v4206_v2, %v6280_v63  ;;  %v652_v61 = vand.u32 4294901760, %v651_v51  ;;  %3081 = vmatpush3.msra.mxu0 %v4202_v8  ;;  %v4264_v27 = vsub.f32 %v4086_v28, %v4124_v35 }
  0x24   :  { %6563 = vst [vmem:[#allocation38_spill] sm:$0xff] %v4238_v31  ;;  %3129 = vmatprep.subr.mxu1 %v645_v55  ;;  %v42_v37 = vsub.s32 1, %v4238_v31  ;;  %v38_v14 = vsub.s32 0, %v4238_v31  ;;  %3082 = vmatprep.subr.mxu0 %v4219_v54  ;;  %v658_v49 = vsub.f32 %v4228_v0, %v6285_v56  ;;  %v6286_v2 = vand.u32 4294901760, %v4252_v42 }
  0x25   :  { %3130 = vmatpush3.msra.mxu1 %v533_v59  ;;  %v540_v63 = vand.u32 4294901760, %v539_v21  ;;  %6565 = vst [vmem:[#allocation40_spill] sm:$0xff] %v4264_v27  ;;  %3083 = vmatpush3.msra.mxu0 %v4235_v33  ;;  %v4274_v59 = vadd.s32 8, %v4238_v31  ;;  %v6293_v28 = vand.u32 4294901760, %v4264_v27 }
  0x26   :  { %3131 = vmatprep.subr.mxu1 %v652_v61  ;;  %v4268_v55 = vrot.slane %v4248_v20, %v42_v37  ;;  %v4271_v51 = vrot.slane %v4248_v20, %v38_v14  ;;  %v659_v21 = vand.u32 4294901760, %v658_v49  ;;  %v546_v56 = vsub.f32 %v4252_v42, %v6286_v2  ;;  %3170 = vmatprep.subr.mxu0 %v3858_v19 }
  0x27   :  { %6566 = vst [vmem:[#allocation41_spill] sm:$0xff] %v4274_v59  ;;  %3132 = vmatpush3.msra.mxu1 %v540_v63  ;;  %v4282_v61 = vsub.f32 %v4100_v45, %v4138_v58  ;;  %v4291_v49 = vsub.f32 %v4116_v40, %v4154_v15  ;;  %v6289_v63 = vmov 0.0   ;;  %v665_v40 = vsub.f32 %v4264_v27, %v6293_v28 }
  0x28   :  { %vm53_vm0 = vcmp.eq.s32.totalorder %v4268_v55, %v4238_v31  ;;  %vm52_vm1 = vcmp.eq.s32.totalorder %v4271_v51, %v4238_v31  ;;  %vm57_vm2 = vcmp.eq.s32.totalorder %v4268_v55, %v4274_v59  ;;  %3133 = vmatprep.subr.mxu1 %v659_v21  ;;  %v547_v37 = vand.u32 4294901760, %v546_v56 }
  0x29   :  { %6567 = vst [vmem:[#allocation42_spill] sm:$0xff] %v4282_v61  ;;  %6568 = vst [vmem:[#allocation43_spill] sm:$0xff] %v4291_v49  ;;  %v2909_v45 = vsel %vm53_vm0, 1.0, %v6289_v63  ;;  %v2908_v14 = vsel %vm52_vm1, 1.0, %v6289_v63  ;;  %v6296_v2 = vmov 1.0   ;;  %v6298_v56 = vand.u32 4294901760, %v4282_v61 }
  0x2a   :  { %2944 = vmatprep.mubr.msk.f32.mxu1 %vm53_vm0, %v6296_v2  ;;  %v4310_v21 = vsub.f32 %v2909_v45, %v2909_v45  ;;  %v4312_v20 = vsub.f32 %v2908_v14, %v2908_v14  ;;  %v6301_v19 = vand.u32 4294901760, %v4291_v49  ;;  %3134 = vmatpush3.msra.mxu1 %v547_v37  ;;  %v666_v63 = vand.u32 4294901760, %v665_v40 }
  0x2b   :  { %v6569_v15 = vmov 0.0   ;;  %v4322_v58 = vsub.f32 %v4129_v38, %v4166_v48  ;;  %vm56_vm3 = vcmp.eq.s32.totalorder %v4271_v51, %v4274_v59  ;;  %v553_v37 = vsub.f32 %v4282_v61, %v6298_v56 }
  0x2c   :  { %v2913_v28 = vsel %vm57_vm2, 1.0, %v6569_v15  ;;  %v672_v40 = vsub.f32 %v4291_v49, %v6301_v19  ;;  %3135 = vmatprep.subr.mxu1 %v666_v63  ;;  %v2912_v45 = vsel %vm56_vm3, 1.0, %v6569_v15  ;;  %v4343_v14 = vsub.f32 %v4143_v30, %v4180_v57 }
  0x2d   :  { %v4334_v2 = vsub.f32 %v2913_v28, %v2913_v28  ;;  %v6570_v56 = vand.u32 4294901760, %v4310_v21  ;;  %v6571_v19 = vand.u32 4294901760, %v4312_v20  ;;  %v554_v63 = vand.u32 4294901760, %v553_v37 }
  0x2e   :  { %v673_v35 = vand.u32 4294901760, %v672_v40  ;;  %v6572_v7 = vand.u32 4294901760, %v4322_v58  ;;  %v4355_v61 = vsub.f32 %v2912_v45, %v2912_v45  ;;  %v6314_v30 = vand.u32 4294901760, %v4343_v14 }
  0x2f   :  { %v332_v48 = vsub.f32 %v4310_v21, %v6570_v56  ;;  %v338_v28 = vsub.f32 %v4312_v20, %v6571_v19  ;;  %v6319_v38 = vand.u32 4294901760, %v4334_v2  ;;  %3136 = vmatpush3.msra.mxu1 %v554_v63  ;;  %v4360_v56 = vsub.f32 %v4171_v52, %v4202_v8 }
  0x30   :  { %v560_v49 = vsub.f32 %v4322_v58, %v6572_v7  ;;  %v4364_v19 = vsub.f32 %v4185_v13, %v4219_v54  ;;  %3137 = vmatprep.subr.mxu1 %v673_v35  ;;  %v6318_v37 = vand.u32 4294901760, %v4355_v61  ;;  %v4376_v13 = vadd.s32 16, %v4238_v31 }
  0x31   :  { %v333_v57 = vand.u32 4294901760, %v332_v48  ;;  %v339_v27 = vand.u32 4294901760, %v338_v28  ;;  %v347_v7 = vsub.f32 %v4334_v2, %v6319_v38  ;;  %v679_v48 = vsub.f32 %v4343_v14, %v6314_v30 }
  0x32   :  { %v561_v45 = vand.u32 4294901760, %v560_v49  ;;  %v6316_v52 = vand.u32 4294901760, %v4360_v56  ;;  %v6315_v40 = vand.u32 4294901760, %v4364_v19  ;;  %6573 = vst [vmem:[#allocation44_spill] sm:$0xff] %v4376_v13  ;;  %v4380_v35 = vsub.f32 %v4211_v6, %v4235_v33 }
  0x33   :  { %334 = vmatprep.mubr.f32.mxu0 %v333_v57  ;;  %v348_v49 = vand.u32 4294901760, %v347_v7  ;;  %v353_v28 = vsub.f32 %v4355_v61, %v6318_v37  ;;  %v680_v63 = vand.u32 4294901760, %v679_v48  ;;  %v4386_v57 = vadd.s32 24, %v4238_v31 }
  0x34   :  { %6574 = vst [vmem:[#allocation45_spill] sm:$0xff] %v4380_v35  ;;  %340 = vmatmul.mubr.f32.vlgmr.msra.gmra.mxu0 %v339_v27  ;;  %3138 = vmatpush3.msra.mxu1 %v561_v45  ;;  %v567_v30 = vsub.f32 %v4360_v56, %v6316_v52  ;;  %v686_v6 = vsub.f32 %v4364_v19, %v6315_v40  ;;  %v6317_v27 = vand.u32 4294901760, %v4380_v35  ;;  %v6579_v38 = vmov 1.0  }
  0x35   :  { %6575 = vst [vmem:[#allocation46_spill] sm:$0xff] %v4386_v57  ;;  %3171 = vmatpush3.msra.mxu0 %v3880_v24  ;;  %vm6342_vm4 = vcmp.eq.s32.totalorder %v4268_v55, %v4376_v13  ;;  %349 = vmatprep.mubr.f32.mxu0 %v348_v49  ;;  %v354_v7 = vand.u32 4294901760, %v353_v28  ;;  %vm6345_vm5 = vcmp.eq.s32.totalorder %v4271_v51, %v4376_v13  ;;  %v4515_v59 = vadd.s32 56, %v4238_v31 }
  0x36   :  { %3139 = vmatprep.subr.mxu1 %v680_v63  ;;  %v2917_v45 = vsel %vm6342_vm4, 1.0, %v6569_v15  ;;  %vm65_vm6 = vcmp.eq.s32.totalorder %v4268_v55, %v4386_v57  ;;  %v568_v48 = vand.u32 4294901760, %v567_v30  ;;  %v687_v40 = vand.u32 4294901760, %v686_v6  ;;  %3172 = vmatprep.subr.mxu0 %v3886_v26 }
  0x37   :  { %v4407_v52 = vsub.f32 %v2917_v45, %v2917_v45  ;;  %v574_v49 = vsub.f32 %v4380_v35, %v6317_v27  ;;  %v2916_v28 = vsel %vm6345_vm5, 1.0, %v6569_v15  ;;  %v2921_v30 = vsel %vm65_vm6, 1.0, %v6569_v15  ;;  %3173 = vmatpush3.msra.mxu0 %v3909_v32  ;;  %6586 = vst [vmem:[#allocation54_spill] sm:$0xff] %v4515_v59 }
  0x38   :  { %355 = vmatmul.mubr.f32.gmra.mxu0 %v354_v7  ;;  %vm64_vm7 = vcmp.eq.s32.totalorder %v4271_v51, %v4386_v57  ;;  %v4423_v63 = vadd.s32 32, %v4238_v31  ;;  %3140 = vmatpush3.msra.mxu1 %v568_v48  ;;  %v4427_v45 = vsub.f32 %v2916_v28, %v2916_v28  ;;  %v4429_v27 = vsub.f32 %v2921_v30, %v2921_v30  ;;  %v6596_v57 = vld [vmem:[#allocation9_spill] sm:$0xff] }
  0x39   :  { %v6320_v6 = vand.u32 4294901760, %v4407_v52  ;;  %v575_v7 = vand.u32 4294901760, %v574_v49  ;;  %3141 = vmatprep.subr.mxu1 %v687_v40  ;;  %3174 = vmatprep.subr.mxu0 %v3918_v36  ;;  %v2920_v37 = vsel %vm64_vm7, 1.0, %v6569_v15  ;;  %v4441_v48 = vadd.s32 40, %v4238_v31 }
  0x3a   :  { %6576 = vst [vmem:[#allocation47_spill] sm:$0xff] %v4423_v63  ;;  %6577 = vst [vmem:[#allocation48_spill] sm:$0xff] %v4429_v27  ;;  %vm69_vm8 = vcmp.eq.s32.totalorder %v4268_v55, %v4423_v63  ;;  %vm68_vm9 = vcmp.eq.s32.totalorder %v4271_v51, %v4423_v63  ;;  %v6324_v49 = vand.u32 4294901760, %v4427_v45  ;;  %3175 = vmatpush3.msra.mxu0 %v3934_v41  ;;  %v6580_v41 = vand.u32 4294901760, %v4429_v27 }
  0x3b   :  { %6578 = vst [vmem:[#allocation49_spill] sm:$0xff] %v4441_v48  ;;  %v362_v40 = vsub.f32 %v4407_v52, %v6320_v6  ;;  %3142 = vmatpush3.msra.mxu1 %v575_v7  ;;  %v4449_v30 = vsub.f32 %v2920_v37, %v2920_v37  ;;  %v2925_v7 = vsel %vm69_vm8, 1.0, %v6569_v15  ;;  %v2924_v6 = vsel %vm68_vm9, 1.0, %v6569_v15  ;;  %3176 = vmatprep.subr.mxu0 %v3948_v46 }
  0x3c   :  { %2945 = vmatmul.mubr.msk.f32.vlgmr.msra.gmra.mxu1 %vm52_vm1, %v6579_v38  ;;  %3229 = vmatprep.subr.mxu1 %v3817_v3  ;;  %vm73_vm10 = vcmp.eq.s32.totalorder %v4268_v55, %v4441_v48  ;;  %vm72_vm11 = vcmp.eq.s32.totalorder %v4271_v51, %v4441_v48  ;;  %v368_v28 = vsub.f32 %v4427_v45, %v6324_v49  ;;  %v6617_v48 = vld [vmem:[#allocation30_spill] sm:$0xff] }
  0x3d   :  { %v363_v37 = vand.u32 4294901760, %v362_v40  ;;  %3230 = vmatpush3.msra.mxu1 %v3819_v4  ;;  %v377_v3 = vsub.f32 %v4429_v27, %v6580_v41  ;;  %2946 = vmatprep.mubr.msk.f32.mxu1 %vm57_vm2, %v6579_v38  ;;  %v4482_v40 = vsub.f32 %v2925_v7, %v2925_v7  ;;  %v4484_v49 = vsub.f32 %v2924_v6, %v2924_v6 }
  0x3e   :  { %3177 = vmatpush3.msra.mxu0 %v3983_v60  ;;  %v2929_v46 = vsel %vm73_vm10, 1.0, %v6569_v15  ;;  %v2928_v41 = vsel %vm72_vm11, 1.0, %v6569_v15  ;;  %v369_v36 = vand.u32 4294901760, %v368_v28  ;;  %3231 = vmatprep.subr.mxu1 %v3821_v5  ;;  %v6582_v7 = vand.u32 4294901760, %v4449_v30 }
  0x3f   :  { %6581 = vst [vmem:[#allocation50_spill] sm:$0xff] %v4484_v49  ;;  %364 = vmatprep.mubr.f32.mxu0 %v363_v37  ;;  %v378_v27 = vand.u32 4294901760, %v377_v3  ;;  %v4498_v60 = vsub.f32 %v2929_v46, %v2929_v46  ;;  %3178 = vmatprep.subr.mxu0 %v3999_v1  ;;  %v6333_v4 = vand.u32 4294901760, %v4482_v40  ;;  %v6334_v28 = vand.u32 4294901760, %v4484_v49 }
  0x40   :  { %v383_v6 = vsub.f32 %v4449_v30, %v6582_v7  ;;  %2947 = vmatmul.mubr.msk.f32.gmra.mxu1 %vm56_vm3, %v6579_v38  ;;  %v4507_v3 = vsub.f32 %v2928_v41, %v2928_v41  ;;  %v4510_v37 = vadd.s32 48, %v4238_v31  ;;  %370 = vmatmul.mubr.f32.gmra.mxu0 %v369_v36  ;;  %v4518_v1 = vadd.s32 64, %v4238_v31 }
  0x41   :  { %6583 = vst [vmem:[#allocation51_spill] sm:$0xff] %v4498_v60  ;;  %3232 = vmatpush3.msra.mxu1 %v3832_v9  ;;  %v6335_v46 = vand.u32 4294901760, %v4498_v60  ;;  %379 = vmatprep.mubr.f32.mxu0 %v378_v27  ;;  %v392_v41 = vsub.f32 %v4482_v40, %v6333_v4  ;;  %v398_v36 = vsub.f32 %v4484_v49, %v6334_v28 }
  0x42   :  { %6584 = vst [vmem:[#allocation52_spill] sm:$0xff] %v4507_v3  ;;  %6585 = vst [vmem:[#allocation53_spill] sm:$0xff] %v4510_v37  ;;  %v384_v7 = vand.u32 4294901760, %v383_v6  ;;  %3179 = vmatpush3.msra.mxu0 %v4013_v12  ;;  %vm77_vm12 = vcmp.eq.s32.totalorder %v4268_v55, %v4510_v37  ;;  %3233 = vmatprep.subr.mxu1 %v3834_v10  ;;  %vm76_vm13 = vcmp.eq.s32.totalorder %v4271_v51, %v4510_v37  ;;  %v6616_v37 = vld [vmem:[#allocation28_spill] sm:$0xff] }
  0x43   :  { %6587 = vst [vmem:[#allocation55_spill] sm:$0xff] %v4518_v1  ;;  %3180 = vmatprep.subr.mxu0 %v4027_v44  ;;  %v407_v27 = vsub.f32 %v4498_v60, %v6335_v46  ;;  %v2933_v4 = vsel %vm77_vm12, 1.0, %v6569_v15  ;;  %vm81_vm14 = vcmp.eq.s32.totalorder %v4268_v55, %v4515_v59  ;;  %3234 = vmatpush3.msra.mxu1 %v3836_v11  ;;  %v393_v28 = vand.u32 4294901760, %v392_v41 }
  0x44   :  { %2948 = vmatprep.mubr.msk.f32.mxu1 %vm6342_vm4, %v6579_v38  ;;  %v399_v46 = vand.u32 4294901760, %v398_v36  ;;  %v4548_v6 = vsub.f32 %v2933_v4, %v2933_v4  ;;  %385 = vmatmul.mubr.f32.gmra.mxu0 %v384_v7  ;;  %v6589_v31 = vand.u32 4294901760, %v4507_v3  ;;  %v2932_v41 = vsel %vm76_vm13, 1.0, %v6569_v15 }
  0x45   :  { %3235 = vmatprep.subr.mxu1 %v3850_v16  ;;  %v2937_v49 = vsel %vm81_vm14, 1.0, %v6569_v15  ;;  %vm80_vm15 = vcmp.eq.s32.totalorder %v4271_v51, %v4515_v59  ;;  %394 = vmatprep.mubr.f32.mxu0 %v393_v28  ;;  %v4566_v7 = vsub.f32 %v2932_v41, %v2932_v41  ;;  %v408_v36 = vand.u32 4294901760, %v407_v27  ;;  %v6621_v59 = vld [vmem:[#allocation33_spill] sm:$0xff] }
  0x46   :  { %6588 = vst [vmem:[#allocation56_spill] sm:$0xff] %v4548_v6  ;;  %v413_v60 = vsub.f32 %v4507_v3, %v6589_v31  ;;  %3181 = vmatpush3.msra.mxu0 %v4039_v53  ;;  %v6348_v4 = vand.u32 4294901760, %v4548_v6  ;;  %v4568_v31 = vsub.f32 %v2937_v49, %v2937_v49  ;;  %2949 = vmatmul.mubr.msk.f32.gmra.mxu1 %vm6345_vm5, %v6579_v38  ;;  %v2936_v28 = vsel %vm80_vm15, 1.0, %v6569_v15 }
  0x47   :  { %6590 = vst [vmem:[#allocation57_spill] sm:$0xff] %v4566_v7  ;;  %3182 = vmatprep.subr.mxu0 %v4056_v22  ;;  %vm85_vm4 = vcmp.eq.s32.totalorder %v4268_v55, %v4518_v1  ;;  %3236 = vmatpush3.msra.mxu1 %v3852_v17  ;;  %v6349_v41 = vand.u32 4294901760, %v4566_v7  ;;  %v4587_v13 = vsub.f32 %v2936_v28, %v2936_v28 }
  0x48   :  { %6591 = vst [vmem:[#allocation58_spill] sm:$0xff] %v4568_v31  ;;  %3183 = vmatpush3.msra.mxu0 %v4068_v43  ;;  %v422_v49 = vsub.f32 %v4548_v6, %v6348_v4  ;;  %vm6382_vm5 = vcmp.eq.s32.totalorder %v4271_v51, %v4518_v1  ;;  %3237 = vmatprep.subr.mxu1 %v3855_v18  ;;  %v414_v27 = vand.u32 4294901760, %v413_v60  ;;  %v2941_v3 = vsel %vm85_vm4, 1.0, %v6569_v15  ;;  %v6630_v1 = vld [vmem:[#allocation13_spill] sm:$0xff] }
  0x49   :  { %6592 = vst [vmem:[#allocation59_spill] sm:$0xff] %v4587_v13  ;;  %400 = vmatmul.mubr.f32.gmra.mxu0 %v399_v46  ;;  %3184 = vmatprep.subr.mxu0 %v4095_v50  ;;  %v428_v28 = vsub.f32 %v4566_v7, %v6349_v41  ;;  %v2940_v60 = vsel %vm6382_vm5, 1.0, %v6569_v15  ;;  %v4616_v41 = vsub.f32 %v2941_v3, %v2941_v3  ;;  %v6594_v15 = vand.u32 4294901760, %v4568_v31  ;;  %v6598_v3 = vld [vmem:[#allocation10_spill] sm:$0xff] }
  0x4a   :  { %3238 = vmatpush3.msra.mxu1 %v3877_v23  ;;  %409 = vmatprep.mubr.f32.mxu0 %v408_v36  ;;  %v423_v46 = vand.u32 4294901760, %v422_v49  ;;  %v6358_v36 = vand.u32 4294901760, %v4587_v13  ;;  %v4624_v6 = vsub.f32 %v2940_v60, %v2940_v60  ;;  %v6597_v49 = vld [vmem:[#allocation31_spill] sm:$0xff] }
  0x4b   :  { %2950 = vmatprep.mubr.msk.f32.mxu1 %vm65_vm6, %v6579_v38  ;;  %3185 = vmatpush3.msra.mxu0 %v4111_v29  ;;  %6593 = vst [vmem:[#allocation60_spill] sm:$0xff] %v4616_v41  ;;  %v429_v4 = vand.u32 4294901760, %v428_v28  ;;  %v437_v7 = vsub.f32 %v4568_v31, %v6594_v15  ;;  %v6599_v15 = vld [vmem:[#allocation12_spill] sm:$0xff] }
  0x4c   :  { %2951 = vmatmul.mubr.msk.f32.gmra.mxu1 %vm64_vm7, %v6579_v38  ;;  %3186 = vmatprep.subr.mxu0 %v4135_v34  ;;  %6595 = vst [vmem:[#allocation61_spill] sm:$0xff] %v4624_v6  ;;  %v6367_v60 = vand.u32 4294901760, %v4624_v6 }
  0x4d   :  { %415 = vmatmul.mubr.f32.gmra.mxu0 %v414_v27  ;;  %3239 = vmatprep.subr.mxu1 %v3883_v25  ;;  %v443_v27 = vsub.f32 %v4587_v13, %v6358_v36  ;;  %v438_v28 = vand.u32 4294901760, %v437_v7  ;;  %v6601_v36 = vld [vmem:[#allocation34_spill] sm:$0xff]  ;;  %v6602_v13 = vand.u32 4294901760, %v4616_v41 }
  0x4e   :  { %3187 = vmatpush3.msra.mxu0 %v4151_v47  ;;  %3240 = vmatpush3.msra.mxu1 %v6596_v57  ;;  %v6604_v7 = vld [vmem:[#allocation18_spill] sm:$0xff]  ;;  %v458_v63 = vsub.f32 %v4624_v6, %v6367_v60  ;;  %v6608_v60 = vld [vmem:[#allocation21_spill] sm:$0xff] }
  0x4f   :  { %3188 = vmatprep.subr.mxu0 %v6597_v49  ;;  %3241 = vmatprep.subr.mxu1 %v6598_v3  ;;  %v444_v47 = vand.u32 4294901760, %v443_v27  ;;  %v452_v31 = vsub.f32 %v4616_v41, %v6602_v13  ;;  %v6605_v27 = vld [vmem:[#allocation20_spill] sm:$0xff]  ;;  %v6607_v41 = vld [vmem:[#allocation42_spill] sm:$0xff] }
  0x50   :  { %424 = vmatprep.mubr.f32.mxu0 %v423_v46  ;;  %2952 = vmatprep.mubr.msk.f32.mxu1 %vm69_vm8, %v6579_v38  ;;  %v6600_v46 = vld [vmem:[#allocation14_spill] sm:$0xff]  ;;  %v459_v6 = vand.u32 4294901760, %v458_v63  ;;  %v6612_v63 = vld [vmem:[#allocation24_spill] sm:$0xff] }
  0x51   :  { %3189 = vmatpush3.msra.mxu0 %v4177_v39  ;;  %3242 = vmatpush3.msra.mxu1 %v6599_v15  ;;  %v453_v13 = vand.u32 4294901760, %v452_v31  ;;  %v6613_v31 = vld [vmem:[#allocation25_spill] sm:$0xff] }
  0x52   :  { %430 = vmatmul.mubr.f32.gmra.mxu0 %v429_v4  ;;  %2953 = vmatmul.mubr.msk.f32.gmra.mxu1 %vm68_vm9, %v6579_v38  ;;  %v6603_v4 = vld [vmem:[#allocation16_spill] sm:$0xff] }
  0x53   :  { %3190 = vmatprep.subr.mxu0 %v4194_v62  ;;  %3243 = vmatprep.subr.mxu1 %v6600_v46 }
  0x54   :  { %3191 = vmatpush3.msra.mxu0 %v6601_v36  ;;  %3244 = vmatpush3.msra.mxu1 %v6603_v4 }
  0x55   :  { %3192 = vmatprep.subr.mxu0 %v4228_v0  ;;  %3245 = vmatprep.subr.mxu1 %v6604_v7  ;;  %v6609_v7 = vld [vmem:[#allocation43_spill] sm:$0xff]  ;;  %v6610_v0 = vld [vmem:[#allocation22_spill] sm:$0xff] }
  0x56   :  { %439 = vmatprep.mubr.f32.mxu0 %v438_v28  ;;  %2954 = vmatprep.mubr.msk.f32.mxu1 %vm73_vm10, %v6579_v38  ;;  %v6606_v28 = vld [vmem:[#allocation40_spill] sm:$0xff] }
  0x57   :  { %3193 = vmatpush3.msra.mxu0 %v4252_v42  ;;  %3246 = vmatpush3.msra.mxu1 %v6605_v27 }
  0x58   :  { %445 = vmatmul.mubr.f32.gmra.mxu0 %v444_v47  ;;  %2955 = vmatmul.mubr.msk.f32.gmra.mxu1 %vm72_vm11, %v6579_v38  ;;  %v6611_v47 = vld [vmem:[#allocation23_spill] sm:$0xff] }
  0x59   :  { %3194 = vmatprep.subr.mxu0 %v6606_v28  ;;  %3247 = vmatprep.subr.mxu1 %v6608_v60 }
  0x5a   :  { %3195 = vmatpush3.msra.mxu0 %v6607_v41  ;;  %3248 = vmatpush3.msra.mxu1 %v6610_v0 }
  0x5b   :  { %3196 = vmatprep.subr.mxu0 %v6609_v7  ;;  %454 = vmatprep.mubr.f32.mxu0 %v453_v13  ;;  %v6614_v13 = vld [vmem:[#allocation26_spill] sm:$0xff] }
  0x5c   :  { %2956 = vmatprep.mubr.msk.f32.mxu1 %vm77_vm12, %v6579_v38  ;;  %3197 = vmatpush3.msra.mxu0 %v4322_v58 }
  0x5d   :  { %3249 = vmatprep.subr.mxu1 %v6611_v47  ;;  %460 = vmatmul.mubr.f32.gmra.mxu0 %v459_v6  ;;  %v6615_v6 = vld [vmem:[#allocation27_spill] sm:$0xff] }
  0x5e   :  { %2957 = vmatmul.mubr.msk.f32.gmra.mxu1 %vm76_vm13, %v6579_v38  ;;  %3198 = vmatprep.subr.mxu0 %v4343_v14 }
  0x5f   :  { %3250 = vmatpush3.msra.mxu1 %v6612_v63  ;;  %3199 = vmatpush3.msra.mxu0 %v4360_v56 }
  0x60   :  { %3251 = vmatprep.subr.mxu1 %v6613_v31  ;;  %3200 = vmatprep.subr.mxu0 %v4364_v19 }
  0x61   :  { %3252 = vmatpush3.msra.mxu1 %v6614_v13  ;;  %2958 = vmatprep.mubr.msk.f32.mxu1 %vm81_vm14, %v6579_v38 }
  0x62   :  { %3201 = vmatpush3.msra.mxu0 %v4380_v35  ;;  %883 = vmatprep.mubr.f32.mxu0 %v4310_v21  ;;  %v6618_v35 = vld [vmem:[#allocation32_spill] sm:$0xff] }
  0x63   :  { %3253 = vmatprep.subr.mxu1 %v6615_v6  ;;  %2959 = vmatmul.mubr.msk.f32.gmra.mxu1 %vm80_vm15, %v6579_v38  ;;  %v6619_v6 = vld [vmem:[#allocation8_spill] sm:$0xff] }
  0x64   :  { %886 = vmatmul.mubr.f32.vlgmr.msra.gmra.mxu0 %v4312_v20  ;;  %3254 = vmatpush3.msra.mxu1 %v6616_v37  ;;  %v6620_v13 = vand.u32 4294901760, %v6619_v6  ;;  %v6622_v37 = vand.u32 4294901760, %v3880_v24  ;;  %v6625_v6 = vand.u32 4294901760, %v3909_v32  ;;  %v6626_v24 = vand.u32 4294901760, %v4312_v20  ;;  %v6635_v32 = vld [vmem:[#allocation48_spill] sm:$0xff] }
  0x65   :  { %2960 = vmatprep.mubr.msk.f32.mxu1 %vm85_vm4, %v6579_v38  ;;  %3255 = vmatprep.subr.mxu1 %v6617_v48  ;;  %v6623_v48 = vand.u32 4294901760, %v3886_v26  ;;  %v6636_v20 = vand.u32 4294901760, %v4334_v2 }
  0x66   :  { %892 = vmatprep.mubr.f32.mxu0 %v4334_v2  ;;  %3256 = vmatpush3.msra.mxu1 %v6618_v35  ;;  %v6643_v2 = vand.u32 4294901760, %v4027_v44  ;;  %v6650_v44 = vand.u32 4294901760, %v4095_v50  ;;  %v6657_v50 = vld [vmem:[#allocation29_spill] sm:$0xff] }
  0x67   :  { %3288 = vmatprep.subr.mxu0 %v6620_v13  ;;  %2961 = vmatmul.mubr.msk.f32.gmra.mxu1 %vm6382_vm5, %v6579_v38  ;;  %v6624_v13 = vand.u32 4294901760, %v4310_v21  ;;  %v6633_v21 = vld [vmem:[#allocation15_spill] sm:$0xff] }
  0x68   :  { %895 = vmatmul.mubr.f32.gmra.mxu0 %v4355_v61  ;;  %3257 = vmatprep.subr.mxu1 %v6621_v59 }
  0x69   :  { %3289 = vmatpush3.msra.mxu0 %v6622_v37  ;;  %3258 = vmatpush3.msra.mxu1 %v4202_v8  ;;  %v6627_v37 = vld [vmem:[#allocation11_spill] sm:$0xff] }
  0x6a   :  { %3290 = vmatprep.subr.mxu0 %v6623_v48  ;;  %3259 = vmatprep.subr.mxu1 %v4219_v54  ;;  %v6628_v26 = vand.u32 4294901760, %v6627_v37  ;;  %v6629_v48 = vld [vmem:[#allocation6_spill] sm:$0xff]  ;;  %v6631_v54 = vand.u32 4294901760, %v6630_v1  ;;  %v6639_v1 = vand.u32 4294901760, %v4355_v61  ;;  %v6642_v37 = vand.u32 4294901760, %v4013_v12 }
  0x6b   :  { %901 = vmatprep.mubr.f32.mxu0 %v4407_v52  ;;  %3260 = vmatpush3.msra.mxu1 %v4235_v33  ;;  %v6632_v33 = vld [vmem:[#allocation7_spill] sm:$0xff]  ;;  %v6645_v61 = vand.u32 4294901760, %v4039_v53  ;;  %v6647_v12 = vand.u32 4294901760, %v4427_v45  ;;  %v6652_v53 = vand.u32 4294901760, %v6635_v32 }
  0x6c   :  { %1062 = vmatprep.mubr.f32.mxu1 %v6624_v13  ;;  %3291 = vmatpush3.msra.mxu0 %v6625_v6  ;;  %v6634_v13 = vand.u32 4294901760, %v6633_v21  ;;  %v6637_v6 = vld [vmem:[#allocation17_spill] sm:$0xff]  ;;  %v216_v21 = vld [vmem:[%s6236_s1 + $0x178] sm:$0xff] }
  0x6d   :  { %1066 = vmatmul.mubr.f32.vlgmr.msra.gmra.mxu1 %v6626_v24  ;;  %904 = vmatmul.mubr.f32.gmra.mxu0 %v4427_v45  ;;  %v6638_v24 = vand.u32 4294901760, %v6637_v6  ;;  %v6661_v45 = vand.u32 4294901760, %v4482_v40 }
  0x6e   :  { %3292 = vmatprep.subr.mxu0 %v6628_v26  ;;  %3347 = vmatprep.subr.mxu1 %v6629_v48  ;;  %v6675_v48 = vand.u32 4294901760, %v6606_v28  ;;  %v231_v28 = vld [vmem:[%s6236_s1 + $0x1f0] sm:$0xff] }
  0x6f   :  { %3293 = vmatpush3.msra.mxu0 %v6631_v54  ;;  %3348 = vmatpush3.msra.mxu1 %v6632_v33  ;;  %v6640_v54 = vld [vmem:[#allocation19_spill] sm:$0xff] }
  0x70   :  { %3294 = vmatprep.subr.mxu0 %v6634_v13  ;;  %910 = vmatprep.mubr.f32.mxu0 %v6635_v32  ;;  %v6641_v33 = vand.u32 4294901760, %v6640_v54  ;;  %v6678_v32 = vld [vmem:[#allocation60_spill] sm:$0xff]  ;;  %v6683_v54 = vand.u32 4294901760, %v4343_v14  ;;  %v6686_v14 = vand.u32 4294901760, %v4364_v19  ;;  %v6693_v19 = vld [vmem:[#allocation38_spill] sm:$0xff] }
  0x71   :  { %1073 = vmatprep.mubr.f32.mxu1 %v6636_v20  ;;  %3295 = vmatpush3.msra.mxu0 %v6638_v24  ;;  %v4851_v24 = vand.u32 4294901760, %v231_v28 }
  0x72   :  { %3349 = vmatprep.subr.mxu1 %v3821_v5  ;;  %913 = vmatmul.mubr.f32.gmra.mxu0 %v4449_v30  ;;  %v6644_v5 = vand.u32 4294901760, %v4407_v52  ;;  %v6659_v52 = vand.u32 4294901760, %v6597_v49  ;;  %v6666_v49 = vand.u32 4294901760, %v6601_v36  ;;  %v232_v36 = vld [vmem:[%s6236_s1 + $0x1f8] sm:$0xff] }
  0x73   :  { %1077 = vmatmul.mubr.f32.gmra.mxu1 %v6639_v1  ;;  %3296 = vmatprep.subr.mxu0 %v6641_v33  ;;  %v4832_v13 = vand.u32 4294901760, %v232_v36  ;;  %v230_v1 = vld [vmem:[%s6236_s1 + $0x1e8] sm:$0xff] }
  0x74   :  { %3350 = vmatpush3.msra.mxu1 %v3832_v9  ;;  %3297 = vmatpush3.msra.mxu0 %v6642_v37  ;;  %v6646_v9 = vld [vmem:[#allocation50_spill] sm:$0xff]  ;;  %v6685_v37 = vand.u32 4294901760, %v4360_v56  ;;  %v6690_v56 = vld [vmem:[#allocation45_spill] sm:$0xff] }
  0x75   :  { %3351 = vmatprep.subr.mxu1 %v3834_v10  ;;  %3298 = vmatprep.subr.mxu0 %v6643_v2  ;;  %v6648_v10 = vand.u32 4294901760, %v4056_v22  ;;  %v6653_v22 = vand.u32 4294901760, %v4111_v29  ;;  %v6660_v29 = vld [vmem:[#allocation56_spill] sm:$0xff]  ;;  %v214_v33 = vld [vmem:[%s6236_s1 + $0x168] sm:$0xff] }
  0x76   :  { %3352 = vmatpush3.msra.mxu1 %v3836_v11  ;;  %919 = vmatprep.mubr.f32.mxu0 %v4482_v40  ;;  %v6649_v11 = vand.u32 4294901760, %v4068_v43  ;;  %v6655_v43 = vld [vmem:[#allocation52_spill] sm:$0xff]  ;;  %v6679_v20 = vand.u32 4294901760, %v6660_v29 }
  0x77   :  { %1084 = vmatprep.mubr.f32.mxu1 %v6644_v5  ;;  %3299 = vmatpush3.msra.mxu0 %v6645_v61  ;;  %v6667_v40 = vld [vmem:[#allocation36_spill] sm:$0xff]  ;;  %v4876_v5 = vand.u32 4294901760, %v230_v1  ;;  %v229_v61 = vld [vmem:[%s6236_s1 + $0x1e0] sm:$0xff] }
  0x78   :  { %3353 = vmatprep.subr.mxu1 %v3850_v16  ;;  %922 = vmatmul.mubr.f32.gmra.mxu0 %v6646_v9  ;;  %v6651_v16 = vld [vmem:[#allocation51_spill] sm:$0xff] }
  0x79   :  { %1088 = vmatmul.mubr.f32.gmra.mxu1 %v6647_v12  ;;  %3300 = vmatprep.subr.mxu0 %v6648_v10  ;;  %v6671_v26 = vand.u32 4294901760, %v6651_v16  ;;  %6688 = vst [vmem:[#allocation31_spill] sm:$0xff] %v4876_v5  ;;  %v6691_v12 = vand.u32 4294901760, %v6690_v56  ;;  %v4888_v10 = vsub.f32 %v231_v28, %v4851_v24  ;;  %v209_v28 = vld [vmem:[%s6236_s1 + $0x140] sm:$0xff] }
  0x7a   :  { %3354 = vmatpush3.msra.mxu1 %v3852_v17  ;;  %3301 = vmatpush3.msra.mxu0 %v6649_v11  ;;  %v6654_v17 = vand.u32 4294901760, %v4449_v30  ;;  %v6664_v30 = vand.u32 4294901760, %v6646_v9  ;;  %v6694_v11 = vld [vmem:[#allocation27_spill] sm:$0xff]  ;;  %v5025_v56 = vand.u32 4294901760, %v209_v28 }
  0x7b   :  { %3355 = vmatprep.subr.mxu1 %v3855_v18  ;;  %3302 = vmatprep.subr.mxu0 %v6650_v44  ;;  %v6656_v18 = vand.u32 4294901760, %v4135_v34  ;;  %v6662_v34 = vand.u32 4294901760, %v4177_v39  ;;  %v6668_v39 = vand.u32 4294901760, %v6667_v40 }
  0x7c   :  { %3356 = vmatpush3.msra.mxu1 %v3877_v23  ;;  %928 = vmatprep.mubr.f32.mxu0 %v6651_v16  ;;  %v6658_v23 = vand.u32 4294901760, %v6657_v50  ;;  %v6697_v50 = vld [vmem:[#allocation28_spill] sm:$0xff]  ;;  %6716 = vst [vmem:[#allocation24_spill] sm:$0xff] %v5025_v56 }
  0x7d   :  { %1095 = vmatprep.mubr.f32.mxu1 %v6652_v53  ;;  %3303 = vmatpush3.msra.mxu0 %v6653_v22  ;;  %v213_v53 = vld [vmem:[%s6236_s1 + $0x160] sm:$0xff] }
  0x7e   :  { %1099 = vmatmul.mubr.f32.gmra.mxu1 %v6654_v17  ;;  %931 = vmatmul.mubr.f32.gmra.mxu0 %v6655_v43 }
  0x7f   :  { %3304 = vmatprep.subr.mxu0 %v6656_v18  ;;  %3357 = vmatprep.subr.mxu1 %v3883_v25  ;;  %v6663_v25 = vld [vmem:[#allocation57_spill] sm:$0xff]  ;;  %v228_v18 = vld [vmem:[%s6236_s1 + $0x1d8] sm:$0xff] }
  0x80   :  { %3305 = vmatpush3.msra.mxu0 %v6658_v23  ;;  %3358 = vmatpush3.msra.mxu1 %v6596_v57  ;;  %v6665_v57 = vand.u32 4294901760, %v4194_v62  ;;  %v6672_v62 = vand.u32 4294901760, %v4252_v42  ;;  %v6676_v42 = vand.u32 4294901760, %v6607_v41  ;;  %v4840_v41 = vand.u32 4294901760, %v216_v21 }
  0x81   :  { %3306 = vmatprep.subr.mxu0 %v6659_v52  ;;  %3359 = vmatprep.subr.mxu1 %v6598_v3  ;;  %v6669_v3 = vld [vmem:[#allocation18_spill] sm:$0xff]  ;;  %v6682_v6 = vand.u32 4294901760, %v6663_v25  ;;  %v6698_v23 = vand.u32 4294901760, %v6678_v32  ;;  %v212_v52 = vld [vmem:[%s6236_s1 + $0x158] sm:$0xff] }
  0x82   :  { %937 = vmatprep.mubr.f32.mxu0 %v6660_v29  ;;  %1106 = vmatprep.mubr.f32.mxu1 %v6661_v45  ;;  %v4871_v2 = vsub.f32 %v216_v21, %v4840_v41  ;;  %v4921_v29 = vsub.f32 %v230_v1, %v4876_v5  ;;  %v6699_v45 = vld [vmem:[#allocation30_spill] sm:$0xff]  ;;  %v6711_v1 = vld [vmem:[#allocation37_spill] sm:$0xff] }
  0x83   :  { %3307 = vmatpush3.msra.mxu0 %v6662_v34  ;;  %3360 = vmatpush3.msra.mxu1 %v6599_v15  ;;  %v6670_v15 = vld [vmem:[#allocation58_spill] sm:$0xff]  ;;  %v6700_v34 = vld [vmem:[#allocation41_spill] sm:$0xff] }
  0x84   :  { %940 = vmatmul.mubr.f32.gmra.mxu0 %v6663_v25  ;;  %1110 = vmatmul.mubr.f32.gmra.mxu1 %v6664_v30  ;;  %v6689_v9 = vand.u32 4294901760, %v6670_v15  ;;  %v6392_v17 = vand.u32 4294901760, %v4871_v2  ;;  %v4931_v30 = vand.u32 4294901760, %v213_v53 }
  0x85   :  { %3308 = vmatprep.subr.mxu0 %v6665_v57  ;;  %3361 = vmatprep.subr.mxu1 %v6600_v46  ;;  %v6673_v46 = vld [vmem:[#allocation59_spill] sm:$0xff]  ;;  %v6389_v57 = vand.u32 4294901760, %v4888_v10 }
  0x86   :  { %3309 = vmatpush3.msra.mxu0 %v6666_v49  ;;  %3362 = vmatpush3.msra.mxu1 %v6603_v4  ;;  %v6674_v4 = vand.u32 4294901760, %v6655_v43  ;;  %v6695_v22 = vand.u32 4294901760, %v6673_v46  ;;  %v4909_v43 = vand.u32 4294901760, %v229_v61  ;;  %6701 = vst [vmem:[#allocation14_spill] sm:$0xff] %v4931_v30  ;;  %v211_v49 = vld [vmem:[%s6236_s1 + $0x150] sm:$0xff]  ;;  %v4973_v21 = vsub.f32 %v213_v53, %v4931_v30 }
  0x87   :  { %3310 = vmatprep.subr.mxu0 %v6668_v39  ;;  %3363 = vmatprep.subr.mxu1 %v6669_v3  ;;  %v4942_v39 = vand.u32 4294901760, %v228_v18 }
  0x88   :  { %946 = vmatprep.mubr.f32.mxu0 %v6670_v15  ;;  %1117 = vmatprep.mubr.f32.mxu1 %v6671_v26  ;;  %6696 = vst [vmem:[#allocation12_spill] sm:$0xff] %v4909_v43  ;;  %v4954_v26 = vand.u32 4294901760, %v212_v52 }
  0x89   :  { %3311 = vmatpush3.msra.mxu0 %v6672_v62  ;;  %3364 = vmatpush3.msra.mxu1 %v6605_v27  ;;  %v6677_v27 = vand.u32 4294901760, %v6609_v7  ;;  %v6680_v7 = vand.u32 4294901760, %v4322_v58  ;;  %6702 = vst [vmem:[#allocation34_spill] sm:$0xff] %v4942_v39  ;;  %v227_v62 = vld [vmem:[%s6236_s1 + $0x1d0] sm:$0xff] }
  0x8a   :  { %949 = vmatmul.mubr.f32.gmra.mxu0 %v6673_v46  ;;  %1121 = vmatmul.mubr.f32.gmra.mxu1 %v6674_v4  ;;  %6704 = vst [vmem:[#allocation16_spill] sm:$0xff] %v4954_v26  ;;  %v4960_v46 = vsub.f32 %v229_v61, %v4909_v43  ;;  %v4965_v4 = vand.u32 4294901760, %v211_v49 }
  0x8b   :  { %3312 = vmatprep.subr.mxu0 %v6675_v48  ;;  %3365 = vmatprep.subr.mxu1 %v6608_v60  ;;  %v215_v60 = vld [vmem:[%s6236_s1 + $0x170] sm:$0xff]  ;;  %v210_v48 = vld [vmem:[%s6236_s1 + $0x148] sm:$0xff] }
  0x8c   :  { %3313 = vmatpush3.msra.mxu0 %v6676_v42  ;;  %3366 = vmatpush3.msra.mxu1 %v6610_v0  ;;  %v6681_v0 = vld [vmem:[#allocation61_spill] sm:$0xff]  ;;  %v4859_v58 = vand.u32 4294901760, %v215_v60  ;;  %6705 = vst [vmem:[#allocation20_spill] sm:$0xff] %v4965_v4  ;;  %v5021_v61 = vsub.f32 %v211_v49, %v4965_v4 }
  0x8d   :  { %3314 = vmatprep.subr.mxu0 %v6677_v27  ;;  %955 = vmatprep.mubr.f32.mxu0 %v6678_v32  ;;  %v6703_v15 = vand.u32 4294901760, %v6681_v0  ;;  %v226_v27 = vld [vmem:[%s6236_s1 + $0x1c8] sm:$0xff]  ;;  %v6707_v32 = vld [vmem:[#allocation44_spill] sm:$0xff] }
  0x8e   :  { %1128 = vmatprep.mubr.f32.mxu1 %v6679_v20  ;;  %3315 = vmatpush3.msra.mxu0 %v6680_v7  ;;  %6684 = vst [vmem:[#allocation9_spill] sm:$0xff] %v4859_v58  ;;  %v4896_v44 = vsub.f32 %v215_v60, %v4859_v58  ;;  %vm6708_vm5 = vcmp.eq.s32.totalorder %v4268_v55, %v6707_v32  ;;  %v4993_v7 = vand.u32 4294901760, %v227_v62  ;;  %6714 = vst [vmem:[#allocation22_spill] sm:$0xff] %v5021_v61 }
  0x8f   :  { %3367 = vmatprep.subr.mxu1 %v6611_v47  ;;  %958 = vmatmul.mubr.f32.gmra.mxu0 %v6681_v0  ;;  %v4862_v47 = vsub.f32 %v232_v36, %v4832_v13  ;;  %v6386_v36 = vand.u32 4294901760, %v4921_v29  ;;  %v4996_v0 = vsub.f32 %v228_v18, %v4942_v39 }
  0x90   :  { %1132 = vmatmul.mubr.f32.gmra.mxu1 %v6682_v6  ;;  %3316 = vmatprep.subr.mxu0 %v6683_v54  ;;  %v6388_v3 = vand.u32 4294901760, %v4896_v44  ;;  %6709 = vst [vmem:[#allocation40_spill] sm:$0xff] %v4993_v7  ;;  %v225_v6 = vld [vmem:[%s6236_s1 + $0x1c0] sm:$0xff]  ;;  %v5048_v49 = vsub.f32 %v227_v62, %v4993_v7  ;;  %v6722_v62 = vld [vmem:[#allocation46_spill] sm:$0xff] }
  0x91   :  { %3368 = vmatpush3.msra.mxu1 %v6612_v63  ;;  %3317 = vmatpush3.msra.mxu0 %v6685_v37  ;;  %v6687_v63 = vld [vmem:[#allocation26_spill] sm:$0xff]  ;;  %v6393_v16 = vand.u32 4294901760, %v4862_v47  ;;  %6710 = vst [vmem:[#allocation42_spill] sm:$0xff] %v4996_v0  ;;  %v6383_v37 = vand.u32 4294901760, %v4960_v46  ;;  %v5039_v18 = vand.u32 4294901760, %v225_v6 }
  0x92   :  { %3369 = vmatprep.subr.mxu1 %v6613_v31  ;;  %3318 = vmatprep.subr.mxu0 %v6686_v14  ;;  %v4885_v31 = vand.u32 4294901760, %v214_v33  ;;  %v1786_v60 = vsub.f32 %v4896_v44, %v6388_v3  ;;  %v5010_v14 = vand.u32 4294901760, %v210_v48  ;;  %6719 = vst [vmem:[#allocation32_spill] sm:$0xff] %v5048_v49  ;;  %v6729_v3 = vld [vmem:[#allocation39_spill] sm:$0xff] }
  0x93   :  { %3370 = vmatpush3.msra.mxu1 %v6687_v63  ;;  %1139 = vmatprep.mubr.f32.mxu1 %v6689_v9  ;;  %v1891_v40 = vsub.f32 %v4862_v47, %v6393_v16  ;;  %v1905_v63 = vsub.f32 %v4921_v29, %v6386_v36  ;;  %v5023_v9 = vand.u32 4294901760, %v226_v27  ;;  %6718 = vst [vmem:[#allocation25_spill] sm:$0xff] %v5039_v18  ;;  %v6733_v16 = vld [vmem:[#allocation47_spill] sm:$0xff] }
  0x94   :  { %3319 = vmatpush3.msra.mxu0 %v6691_v12  ;;  %6692 = vst [vmem:[#allocation10_spill] sm:$0xff] %v4885_v31  ;;  %2962 = vmatprep.mubr.msk.f32.mxu0 %vm53_vm0, %v6579_v38  ;;  %v4929_v25 = vsub.f32 %v214_v33, %v4885_v31  ;;  %v5007_v33 = vsub.f32 %v212_v52, %v4954_v26  ;;  %6713 = vst [vmem:[#allocation43_spill] sm:$0xff] %v5010_v14  ;;  %v208_v12 = vld [vmem:[%s6236_s1 + $0x138] sm:$0xff]  ;;  %v6387_v52 = vand.u32 4294901760, %v4996_v0 }
  0x95   :  { %3371 = vmatprep.subr.mxu1 %v6694_v11  ;;  %1143 = vmatmul.mubr.f32.gmra.mxu1 %v6695_v22  ;;  %v1892_v20 = vand.u32 4294901760, %v1891_v40  ;;  %6715 = vst [vmem:[#allocation23_spill] sm:$0xff] %v5023_v9  ;;  %v6385_v22 = vand.u32 4294901760, %v4973_v21  ;;  %v1912_v40 = vsub.f32 %v4960_v46, %v6383_v37 }
  0x96   :  { %2963 = vmatmul.mubr.msk.f32.vlgmr.msra.gmra.mxu0 %vm52_vm1, %v6579_v38  ;;  %3372 = vmatpush3.msra.mxu1 %v6697_v50  ;;  %v6384_v42 = vand.u32 4294901760, %v4929_v25  ;;  %6712 = vst [vmem:[#allocation21_spill] sm:$0xff] %v5007_v33  ;;  %v46_v50 = vsub.s32 2, %v6693_v19 }
  0x97   :  { %1150 = vmatprep.mubr.f32.mxu1 %v6698_v23  ;;  %3373 = vmatprep.subr.mxu1 %v6699_v45  ;;  %v1787_v23 = vand.u32 4294901760, %v1786_v60  ;;  %v224_v45 = vld [vmem:[%s6236_s1 + $0x1b8] sm:$0xff]  ;;  %v6391_v60 = vand.u32 4294901760, %v5021_v61  ;;  %v1800_v37 = vsub.f32 %v4973_v21, %v6385_v22 }
  0x98   :  { %2964 = vmatprep.mubr.msk.f32.mxu0 %vm57_vm2, %v6579_v38  ;;  %3374 = vmatpush3.msra.mxu1 %v6618_v35  ;;  %v1779_v35 = vsub.f32 %v4871_v2, %v6392_v17  ;;  %v1793_v53 = vsub.f32 %v4929_v25, %v6384_v42  ;;  %v5082_v42 = vand.u32 4294901760, %v224_v45 }
  0x99   :  { %3406 = vmatprep.subr.mxu0 %v4832_v13  ;;  %1154 = vmatmul.mubr.f32.gmra.mxu1 %v6703_v15  ;;  %v5055_v15 = vsub.f32 %v210_v48, %v5010_v14  ;;  %v1906_v48 = vand.u32 4294901760, %v1905_v63  ;;  %v5085_v63 = vsub.f32 %v225_v6, %v5039_v18  ;;  %v223_v6 = vld [vmem:[%s6236_s1 + $0x1b0] sm:$0xff] }
  0x9a   :  { %2965 = vmatmul.mubr.msk.f32.gmra.mxu0 %vm56_vm3, %v6579_v38  ;;  %3375 = vmatprep.subr.mxu1 %v6621_v59  ;;  %v1898_v59 = vsub.f32 %v4888_v10, %v6389_v57  ;;  %v1780_v54 = vand.u32 4294901760, %v1779_v35  ;;  %v6390_v35 = vand.u32 4294901760, %v5007_v33  ;;  %6725 = vst [vmem:[#allocation13_spill] sm:$0xff] %v5082_v42  ;;  %v5113_v57 = vrot.slane %v6729_v3, %v46_v50 }
  0x9b   :  { %3407 = vmatpush3.msra.mxu0 %v4840_v41  ;;  %3376 = vmatpush3.msra.mxu1 %v4202_v8  ;;  %v6706_v8 = vld [vmem:[#allocation35_spill] sm:$0xff]  ;;  %6720 = vst [vmem:[#allocation8_spill] sm:$0xff] %v5055_v15  ;;  %6726 = vst [vmem:[#allocation7_spill] sm:$0xff] %v5085_v63  ;;  %v1801_v3 = vand.u32 4294901760, %v1800_v37  ;;  %v5127_v50 = vand.u32 4294901760, %v223_v6  ;;  %v5134_v17 = vsub.f32 %v224_v45, %v5082_v42  ;;  %v205_v45 = vld [vmem:[%s6236_s1 + $0x120] sm:$0xff] }
  0x9c   :  { %3408 = vmatprep.subr.mxu0 %v4851_v24  ;;  %3377 = vmatprep.subr.mxu1 %v6706_v8  ;;  %v1899_v11 = vand.u32 4294901760, %v1898_v59  ;;  %v5058_v59 = vand.u32 4294901760, %v208_v12  ;;  %v207_v8 = vld [vmem:[%s6236_s1 + $0x130] sm:$0xff]  ;;  %v1807_v22 = vsub.f32 %v5007_v33, %v6390_v35  ;;  %6730 = vst [vmem:[#allocation17_spill] sm:$0xff] %v5113_v57  ;;  %v50_v35 = vsub.s32 3, %v6693_v19 }
  0x9d   :  { %2966 = vmatprep.mubr.msk.f32.mxu0 %vm6708_vm5, %v6579_v38  ;;  %3378 = vmatpush3.msra.mxu1 %v6711_v1  ;;  %v5076_v1 = vsub.f32 %v226_v27, %v5023_v9  ;;  %v1919_v27 = vsub.f32 %v4996_v0, %v6387_v52  ;;  %v6397_v52 = vand.u32 4294901760, %v5055_v15  ;;  %6731 = vst [vmem:[#allocation19_spill] sm:$0xff] %v5127_v50  ;;  %6732 = vst [vmem:[#allocation50_spill] sm:$0xff] %v5134_v17 }
  0x9e   :  { %2980 = vmatprep.mubr.msk.f32.mxu1 %vm53_vm0, %v6579_v38  ;;  %3409 = vmatpush3.msra.mxu0 %v4859_v58  ;;  %vm6717_vm0 = vcmp.eq.s32.totalorder %v4271_v51, %v6707_v32  ;;  %6721 = vst [vmem:[#allocation33_spill] sm:$0xff] %v5058_v59  ;;  %v5109_v36 = vsub.f32 %v208_v12, %v5058_v59  ;;  %v206_v12 = vld [vmem:[%s6236_s1 + $0x128] sm:$0xff] }
  0x9f   :  { %2981 = vmatmul.mubr.msk.f32.vlgmr.msra.gmra.mxu1 %vm52_vm1, %v6579_v38  ;;  %2967 = vmatmul.mubr.msk.f32.gmra.mxu0 %vm6717_vm0, %v6579_v38  ;;  %6724 = vst [vmem:[#allocation6_spill] sm:$0xff] %v5076_v1  ;;  %vm6734_vm1 = vmmov %vm6708_vm5  ;;  %v1920_v37 = vand.u32 4294901760, %v1919_v27  ;;  %v5158_v27 = vsub.f32 %v5055_v15, %v6397_v52  ;;  %vm54_vm5 = vcmp.eq.s32.totalorder %v5113_v57, %v6693_v19 }
  0xa0   :  { %3410 = vmatprep.subr.mxu0 %v4876_v5  ;;  %3465 = vmatprep.subr.mxu1 %v1892_v20  ;;  %v5072_v20 = vsub.f32 %v209_v28, %v5025_v56  ;;  %v6396_v28 = vand.u32 4294901760, %v5048_v49  ;;  %6728 = vst [vmem:[#allocation48_spill] sm:$0xff] %v5109_v36 }
  0xa1   :  { %3411 = vmatpush3.msra.mxu0 %v4885_v31  ;;  %3466 = vmatpush3.msra.mxu1 %v1780_v54  ;;  %v1794_v54 = vand.u32 4294901760, %v1793_v53  ;;  %v1913_v53 = vand.u32 4294901760, %v1912_v40  ;;  %v1808_v40 = vand.u32 4294901760, %v1807_v22 }
  0xa2   :  { %3412 = vmatprep.subr.mxu0 %v4909_v43  ;;  %2968 = vmatprep.mubr.msk.f32.mxu0 %vm65_vm6, %v6579_v38  ;;  %6723 = vst [vmem:[#allocation11_spill] sm:$0xff] %v5072_v20 }
  0xa3   :  { %2982 = vmatprep.mubr.msk.f32.mxu1 %vm57_vm2, %v6579_v38  ;;  %3413 = vmatpush3.msra.mxu0 %v4931_v30  ;;  %vm6737_vm2 = vmmov %vm6717_vm0  ;;  %v5195_v30 = vand.u32 4294901760, %v205_v45 }
  0xa4   :  { %3467 = vmatprep.subr.mxu1 %v1899_v11  ;;  %2969 = vmatmul.mubr.msk.f32.gmra.mxu0 %vm64_vm7, %v6579_v38  ;;  %v5102_v11 = vand.u32 4294901760, %v207_v8 }
  0xa5   :  { %2983 = vmatmul.mubr.msk.f32.gmra.mxu1 %vm56_vm3, %v6579_v38  ;;  %3414 = vmatprep.subr.mxu0 %v4942_v39  ;;  %v221_v39 = vld [vmem:[%s6236_s1 + $0x1a0] sm:$0xff]  ;;  %6741 = vst [vmem:[#allocation29_spill] sm:$0xff] %v5195_v30 }
  0xa6   :  { %6727 = vst [vmem:[#allocation15_spill] sm:$0xff] %v5102_v11  ;;  %3468 = vmatpush3.msra.mxu1 %v1787_v23  ;;  %3415 = vmatpush3.msra.mxu0 %v4954_v26  ;;  %v5119_v23 = vsub.f32 %v5021_v61, %v6391_v60  ;;  %v5148_v60 = vsub.f32 %v207_v8, %v5102_v11 }
  0xa7   :  { %3469 = vmatprep.subr.mxu1 %v1906_v48  ;;  %3416 = vmatprep.subr.mxu0 %v4993_v7  ;;  %v222_v48 = vld [vmem:[%s6236_s1 + $0x1a8] sm:$0xff]  ;;  %v5160_v7 = vand.u32 4294901760, %v206_v12 }
  0xa8   :  { %3470 = vmatpush3.msra.mxu1 %v1794_v54  ;;  %2970 = vmatprep.mubr.msk.f32.mxu0 %vm69_vm8, %v6579_v38  ;;  %v1926_v54 = vsub.f32 %v5048_v49, %v6396_v28  ;;  %6735 = vst [vmem:[#allocation51_spill] sm:$0xff] %v5148_v60  ;;  %v204_v28 = vld [vmem:[%s6236_s1 + $0x118] sm:$0xff]  ;;  %v1815_v22 = vand.u32 4294901760, %v5119_v23  ;;  %v5178_v8 = vand.u32 4294901760, %v222_v48  ;;  %v6740_v23 = vand.u32 4294901760, %v5085_v63 }
  0xa9   :  { %2984 = vmatprep.mubr.msk.f32.mxu1 %vm6734_vm1, %v6579_v38  ;;  %3417 = vmatpush3.msra.mxu0 %v4965_v4  ;;  %6736 = vst [vmem:[#allocation52_spill] sm:$0xff] %v5160_v7  ;;  %v6739_v4 = vand.u32 4294901760, %v5072_v20 }
  0xaa   :  { %3471 = vmatprep.subr.mxu1 %v1913_v53  ;;  %2971 = vmatmul.mubr.msk.f32.gmra.mxu0 %vm68_vm9, %v6579_v38  ;;  %v6738_v53 = vand.u32 4294901760, %v5076_v1  ;;  %v5192_v15 = vsub.f32 %v5085_v63, %v6740_v23 }
  0xab   :  { %2985 = vmatmul.mubr.msk.f32.gmra.mxu1 %vm6737_vm2, %v6579_v38  ;;  %v5183_v26 = vsub.f32 %v5072_v20, %v6739_v4  ;;  %3418 = vmatprep.subr.mxu0 %v5023_v9  ;;  %v220_v4 = vld [vmem:[%s6236_s1 + $0x198] sm:$0xff]  ;;  %v5201_v20 = vsub.f32 %v223_v6, %v5127_v50  ;;  %v5204_v9 = vand.u32 4294901760, %v204_v28  ;;  %v1822_v6 = vand.u32 4294901760, %v5158_v27 }
  0xac   :  { %v1933_v52 = vsub.f32 %v5076_v1, %v6738_v53  ;;  %3472 = vmatpush3.msra.mxu1 %v1801_v3  ;;  %3419 = vmatpush3.msra.mxu0 %v5010_v14  ;;  %v1927_v3 = vand.u32 4294901760, %v1926_v54  ;;  %v3765_v53 = vld [vmem:[%s6235_s0] sm:$0xf]  ;;  %v5215_v1 = vsub.f32 %v206_v12, %v5160_v7  ;;  %v6746_v54 = vand.u32 4294901760, %v5109_v36 }
  0xad   :  { %6742 = vst [vmem:[#allocation56_spill] sm:$0xff] %v5201_v20  ;;  %3473 = vmatprep.subr.mxu1 %v1920_v37  ;;  %6743 = vst [vmem:[#allocation57_spill] sm:$0xff] %v5204_v9  ;;  %v5210_v63 = vrot.slane %v3765_v53, %v50_v35  ;;  %3420 = vmatprep.subr.mxu0 %v5039_v18  ;;  %v5217_v37 = vand.u32 4294901760, %v221_v39  ;;  %v203_v35 = vld [vmem:[%s6236_s1 + $0x110] sm:$0xff]  ;;  %v6747_v53 = vld [vmem:[#allocation49_spill] sm:$0xff]  ;;  %v1829_v12 = vand.u32 4294901760, %v5183_v26 }
  0xae   :  { %3474 = vmatpush3.msra.mxu1 %v1808_v40  ;;  %6744 = vst [vmem:[#allocation36_spill] sm:$0xff] %v5215_v1  ;;  %v5222_v23 = vsub.f32 %v5109_v36, %v6746_v54  ;;  %2972 = vmatprep.mubr.msk.f32.mxu0 %vm73_vm10, %v6579_v38  ;;  %v1934_v40 = vand.u32 4294901760, %v1933_v52  ;;  %v5236_v27 = vand.u32 4294901760, %v220_v4  ;;  %v219_v54 = vld [vmem:[%s6236_s1 + $0x190] sm:$0xff]  ;;  %v5242_v18 = vsub.f32 %v222_v48, %v5178_v8 }
  0xaf   :  { %6745 = vst [vmem:[#allocation18_spill] sm:$0xff] %v5217_v37  ;;  %2986 = vmatprep.mubr.msk.f32.mxu1 %vm65_vm6, %v6579_v38  ;;  %3421 = vmatpush3.msra.mxu0 %v5025_v56  ;;  %v1941_v52 = vand.u32 4294901760, %v5192_v15  ;;  %v6749_v26 = vand.u32 4294901760, %v5134_v17  ;;  %v5254_v36 = vsub.f32 %v205_v45, %v5195_v30  ;;  %v5263_v48 = vsub.f32 %v204_v28, %v5204_v9  ;;  %v5275_v45 = vld [vmem:[%s6236_s1 + $0x188] sm:$0xff] }
  0xb0   :  { %6748 = vst [vmem:[#allocation58_spill] sm:$0xff] %v5236_v27  ;;  %2987 = vmatmul.mubr.msk.f32.gmra.mxu1 %vm64_vm7, %v6579_v38  ;;  %2973 = vmatmul.mubr.msk.f32.gmra.mxu0 %vm72_vm11, %v6579_v38  ;;  %v6750_v15 = vand.u32 4294901760, %v5148_v60  ;;  %vm55_vm3 = vcmp.eq.s32.totalorder %v5210_v63, %v6693_v19  ;;  %v1836_v28 = vand.u32 4294901760, %v5222_v23  ;;  %v5281_v43 = vand.u32 4294901760, %v219_v54  ;;  %v6799_v19 = vld [vmem:[#allocation6_spill] sm:$0xff] }
  0xb1   :  { %v1947_v14 = vsub.f32 %v5134_v17, %v6749_v26  ;;  %3422 = vmatprep.subr.mxu0 %v5082_v42  ;;  %v5270_v26 = vand.u32 4294901760, %v203_v35  ;;  %3475 = vmatprep.subr.mxu1 %v1927_v3  ;;  %v202_v42 = vld [vmem:[%s6236_s1 + $0x108] sm:$0xff]  ;;  %v5295_v23 = vsub.f32 %v220_v4, %v5236_v27  ;;  %vm59_vm6 = vcmp.eq.s32.totalorder %v5210_v63, %v6700_v34  ;;  %v201_v17 = vld [vmem:[%s6236_s1 + $0x100] sm:$0xff] }
  0xb2   :  { %v5268_v56 = vsub.f32 %v5148_v60, %v6750_v15  ;;  %3423 = vmatpush3.msra.mxu0 %v5058_v59  ;;  %6752 = vst [vmem:[#allocation60_spill] sm:$0xff] %v5281_v43  ;;  %3476 = vmatpush3.msra.mxu1 %v1815_v22  ;;  %v5292_v59 = vsub.f32 %v221_v39, %v5217_v37  ;;  %v6753_v15 = vld [vmem:[#allocation53_spill] sm:$0xff]  ;;  %v5307_v39 = vand.u32 4294901760, %v5275_v45  ;;  %v6756_v60 = vmov 0.0  }
  0xb3   :  { %6751 = vst [vmem:[#allocation59_spill] sm:$0xff] %v5270_v26  ;;  %3424 = vmatprep.subr.mxu0 %v5127_v50  ;;  %3477 = vmatprep.subr.mxu1 %v1934_v40  ;;  %v1948_v22 = vand.u32 4294901760, %v1947_v14  ;;  %v6754_v50 = vand.u32 4294901760, %v5201_v20  ;;  %v2911_v4 = vsel %vm55_vm3, 1.0, %v6756_v60  ;;  %v5320_v40 = vsub.f32 %v203_v35, %v5270_v26 }
  0xb4   :  { %2974 = vmatprep.mubr.msk.f32.mxu0 %vm77_vm12, %v6579_v38  ;;  %6755 = vst [vmem:[#allocation61_spill] sm:$0xff] %v5307_v39  ;;  %2988 = vmatprep.mubr.msk.f32.mxu1 %vm69_vm8, %v6579_v38  ;;  %v1843_v14 = vand.u32 4294901760, %v5268_v56  ;;  %v6758_v56 = vand.u32 4294901760, %v5215_v1  ;;  %v2915_v31 = vsel %vm59_vm6, 1.0, %v6756_v60  ;;  %vm6496_vm7 = vcmp.eq.s32.totalorder %v5113_v57, %v6700_v34  ;;  %v6797_v34 = vld [vmem:[#allocation12_spill] sm:$0xff] }
  0xb5   :  { %v1954_v3 = vsub.f32 %v5201_v20, %v6754_v50  ;;  %3425 = vmatpush3.msra.mxu0 %v5102_v11  ;;  %v5322_v50 = vand.u32 4294901760, %v202_v42  ;;  %v217_v20 = vld [vmem:[%s6236_s1 + $0x180] sm:$0xff]  ;;  %v2910_v11 = vsel %vm54_vm5, 1.0, %v6756_v60  ;;  %3478 = vmatpush3.msra.mxu1 %v1822_v6  ;;  %v6759_v6 = vand.u32 4294901760, %v5242_v18  ;;  %s3790_s1 = smov [#allocation3]  }
  0xb6   :  { %2975 = vmatmul.mubr.msk.f32.gmra.mxu0 %vm76_vm13, %v6579_v38  ;;  %v5341_v35 = vsub.f32 %v5215_v1, %v6758_v56  ;;  %2989 = vmatmul.mubr.msk.f32.gmra.mxu1 %vm68_vm9, %v6579_v38  ;;  %v6458_v61 = vand.u32 4294901760, %v5292_v59  ;;  %v5359_v1 = vsub.f32 %v2911_v4, %v2911_v4  ;;  %v5363_v33 = vand.u32 4294901760, %v217_v20  ;;  %s2897_s28 = sshll.u32 %s3790_s1, 4  ;;  %s2898_s28 = int_to_ptr.vmem [resolvable:$true] %s2897_s28 }
  0xb7   :  { %6757 = vst [vmem:[#allocation26_spill] sm:$0xff] %v5322_v50  ;;  %3426 = vmatprep.subr.mxu0 %v5178_v8  ;;  %v1961_v56 = vsub.f32 %v5242_v18, %v6759_v6  ;;  %3479 = vmatprep.subr.mxu1 %v1941_v52  ;;  %v1955_v5 = vand.u32 4294901760, %v1954_v3  ;;  %v5365_v58 = vand.u32 4294901760, %v201_v17  ;;  %v5367_v0 = vsub.f32 %v2910_v11, %v2910_v11  ;;  %v6764_v11 = vld [vmem:[#allocation54_spill] sm:$0xff]  ;;  %s3766_s29 = scalar_lea.vmem %s2898_s28, 1152  ;;  %p3771_p1 = scmp.lt.s32.totalorder %s2898_s28, %s2898_s28 }
  0xb8   :  { %6760 = vst [vmem:[#allocation45_spill] sm:$0xff] %v5359_v1  ;;  %3427 = vmatpush3.msra.mxu0 %v5160_v7  ;;  %6761 = vst [vmem:[#allocation27_spill] sm:$0xff] %v5363_v33  ;;  %3480 = vmatpush3.msra.mxu1 %v1829_v12  ;;  %v5371_v6 = vsub.f32 %v219_v54, %v5281_v43  ;;  %v5373_v4 = vsub.f32 %v2915_v31, %v2915_v31  ;;  %v2914_v52 = vsel %vm6496_vm7, 1.0, %v6756_v60  ;;  %p3767_p0 = scmp.ne.s32.totalorder %s2898_s28, %s3766_s29  ;;  %p3772_p2 = scmp.lt.s32.totalorder %s3766_s29, %s3766_s29 }
  0xb9   :  { %6762 = vst [vmem:[#allocation28_spill] sm:$0xff] %v5367_v0  ;;  %3428 = vmatprep.subr.mxu0 %v5217_v37  ;;  %vm6489_vm8 = vcmp.eq.s32.totalorder %v5210_v63, %v6707_v32  ;;  %3481 = vmatprep.subr.mxu1 %v1948_v22  ;;  %v1850_v12 = vand.u32 4294901760, %v5341_v35  ;;  %v5387_v54 = vsub.f32 %v202_v42, %v5322_v50  ;;  %v6766_v31 = vand.u32 4294901760, %v5254_v36 }
  0xba   :  { %6763 = vst [vmem:[#allocation30_spill] sm:$0xff] %v5373_v4  ;;  %2976 = vmatprep.mubr.msk.f32.mxu0 %vm81_vm14, %v6579_v38  ;;  %2990 = vmatprep.mubr.msk.f32.mxu1 %vm73_vm10, %v6579_v38  ;;  %v1962_v22 = vand.u32 4294901760, %v1961_v56  ;;  %v1968_v42 = vsub.f32 %v5292_v59, %v6458_v61  ;;  %v6767_v37 = vand.u32 4294901760, %v5295_v23  ;;  %v5414_v56 = vsub.f32 %v2914_v52, %v2914_v52  ;;  %p3773_p3 = por %p3772_p2, %p3771_p1 }
  0xbb   :  { %6765 = vst [vmem:[#allocation35_spill] sm:$0xff] %v5387_v54  ;;  %v5392_v3 = vsub.f32 %v5254_v36, %v6766_v31  ;;  %3429 = vmatpush3.msra.mxu0 %v5195_v30  ;;  %3482 = vmatpush3.msra.mxu1 %v1836_v28  ;;  %v2919_v61 = vsel %vm6489_vm8, 1.0, %v6756_v60  ;;  %vm62_vm9 = vcmp.eq.s32.totalorder %v5113_v57, %v6707_v32  ;;  %v6770_v30 = vand.u32 4294901760, %v5263_v48 }
  0xbc   :  { %v5407_v31 = vsub.f32 %v5295_v23, %v6767_v37  ;;  %2977 = vmatmul.mubr.msk.f32.gmra.mxu0 %vm80_vm15, %v6579_v38  ;;  %2991 = vmatmul.mubr.msk.f32.gmra.mxu1 %vm72_vm11, %v6579_v38  ;;  %v5428_v37 = vsub.f32 %v201_v17, %v5365_v58  ;;  %v5434_v49 = vsub.f32 %v5275_v45, %v5307_v39  ;;  %v6772_v45 = vand.u32 4294901760, %v5359_v1  ;;  %p3774_p4 = pnand %p3773_p3, %p3767_p0 }
  0xbd   :  { %3430 = vmatprep.subr.mxu0 %v5236_v27  ;;  %3483 = vmatprep.subr.mxu1 %v1955_v5  ;;  %v1857_v35 = vand.u32 4294901760, %v5392_v3  ;;  %v1863_v27 = vsub.f32 %v5263_v48, %v6770_v30  ;;  %v5443_v7 = vsub.f32 %v217_v20, %v5363_v33  ;;  %v5449_v28 = vsub.f32 %v2919_v61, %v2919_v61  ;;  %v6773_v30 = vld [vmem:[#allocation55_spill] sm:$0xff] }
  0xbe   :  { %6768 = vst [vmem:[#allocation37_spill] sm:$0xff] %v5428_v37  ;;  %6769 = vst [vmem:[#allocation39_spill] sm:$0xff] %v5434_v49  ;;  %3431 = vmatpush3.msra.mxu0 %v5204_v9  ;;  %3484 = vmatpush3.msra.mxu1 %v1843_v14  ;;  %v1642_v52 = vsub.f32 %v5359_v1, %v6772_v45  ;;  %v2918_v5 = vsel %vm62_vm9, 1.0, %v6756_v60  ;;  %vm67_vm10 = vcmp.eq.s32.totalorder %v5210_v63, %v6722_v62 }
  0xbf   :  { %6771 = vst [vmem:[#allocation62_spill] sm:$0xff] %v5443_v7  ;;  %3432 = vmatprep.subr.mxu0 %v5281_v43  ;;  %2978 = vmatprep.mubr.msk.f32.mxu0 %vm85_vm4, %v6579_v38  ;;  %v1969_v61 = vand.u32 4294901760, %v1968_v42  ;;  %v1976_v20 = vand.u32 4294901760, %v5407_v31  ;;  %v6774_v14 = vand.u32 4294901760, %v5367_v0  ;;  %v6775_v17 = vand.u32 4294901760, %v5371_v6 }
  0xc0   :  { %2992 = vmatprep.mubr.msk.f32.mxu1 %vm77_vm12, %v6579_v38  ;;  %3433 = vmatpush3.msra.mxu0 %v5270_v26  ;;  %v6776_v9 = vand.u32 4294901760, %v5373_v4  ;;  %vm66_vm11 = vcmp.eq.s32.totalorder %v5113_v57, %v6722_v62  ;;  %vm6777_vm12 = vcmp.eq.s32.totalorder %v4271_v51, %v6773_v30  ;;  %v1864_v42 = vand.u32 4294901760, %v1863_v27  ;;  %v6814_v62 = vld [vmem:[#allocation20_spill] sm:$0xff] }
  0xc1   :  { %v1648_v3 = vsub.f32 %v5367_v0, %v6774_v14  ;;  %3485 = vmatprep.subr.mxu1 %v1962_v22  ;;  %v1982_v43 = vsub.f32 %v5371_v6, %v6775_v17  ;;  %2979 = vmatmul.mubr.msk.f32.gmra.mxu0 %vm6777_vm12, %v6579_v38  ;;  %v2923_v17 = vsel %vm67_vm10, 1.0, %v6756_v60  ;;  %v1643_v14 = vand.u32 4294901760, %v1642_v52 }
  0xc2   :  { %v1657_v1 = vsub.f32 %v5373_v4, %v6776_v9  ;;  %2993 = vmatmul.mubr.msk.f32.gmra.mxu1 %vm76_vm13, %v6579_v38  ;;  %v5490_v9 = vsub.f32 %v2918_v5, %v2918_v5  ;;  %3434 = vmatprep.subr.mxu0 %v5307_v39  ;;  %v6778_v45 = vand.u32 4294901760, %v5320_v40  ;;  %v6487_v22 = vand.u32 4294901760, %v5449_v28 }
  0xc3   :  { %3486 = vmatpush3.msra.mxu1 %v1850_v12  ;;  %3435 = vmatpush3.msra.mxu0 %v5322_v50  ;;  %v1649_v5 = vand.u32 4294901760, %v1648_v3  ;;  %v6779_v31 = vand.u32 4294901760, %v5414_v56  ;;  %v2922_v27 = vsel %vm66_vm11, 1.0, %v6756_v60  ;;  %v1983_v12 = vand.u32 4294901760, %v1982_v43 }
  0xc4   :  { %v1870_v26 = vsub.f32 %v5320_v40, %v6778_v45  ;;  %3487 = vmatprep.subr.mxu1 %v1969_v61  ;;  %3436 = vmatprep.subr.mxu0 %v5363_v33  ;;  %v6780_v52 = vand.u32 4294901760, %v5434_v49  ;;  %v5514_v3 = vsub.f32 %v2923_v17, %v2923_v17  ;;  %vm71_vm13 = vcmp.eq.s32.totalorder %v5210_v63, %v6733_v16 }
  0xc5   :  { %v1663_v4 = vsub.f32 %v5414_v56, %v6779_v31  ;;  %3488 = vmatpush3.msra.mxu1 %v1857_v35  ;;  %2994 = vmatprep.mubr.msk.f32.mxu1 %vm81_vm14, %v6579_v38  ;;  %v1658_v45 = vand.u32 4294901760, %v1657_v1  ;;  %v6781_v35 = vand.u32 4294901760, %v5387_v54  ;;  %v6782_v31 = vand.u32 4294901760, %v5443_v7 }
  0xc6   :  { %v1989_v61 = vsub.f32 %v5434_v49, %v6780_v52  ;;  %3437 = vmatpush3.msra.mxu0 %v5365_v58  ;;  %v6485_v52 = vand.u32 4294901760, %v5490_v9  ;;  %1644 = vmatprep.mubr.f32.mxu0 %v1643_v14  ;;  %v1871_v0 = vand.u32 4294901760, %v1870_v26  ;;  %v1672_v33 = vsub.f32 %v5449_v28, %v6487_v22  ;;  %v6796_v22 = vld [vmem:[#allocation22_spill] sm:$0xff] }
  0xc7   :  { %v1877_v43 = vsub.f32 %v5387_v54, %v6781_v35  ;;  %v1996_v17 = vsub.f32 %v5443_v7, %v6782_v31  ;;  %3489 = vmatprep.subr.mxu1 %v1976_v20  ;;  %v5533_v50 = vsub.f32 %v2922_v27, %v2922_v27  ;;  %vm70_vm14 = vcmp.eq.s32.totalorder %v5113_v57, %v6733_v16 }
  0xc8   :  { %2995 = vmatmul.mubr.msk.f32.gmra.mxu1 %vm80_vm15, %v6579_v38  ;;  %1650 = vmatmul.mubr.f32.vlgmr.msra.gmra.mxu0 %v1649_v5  ;;  %v1664_v1 = vand.u32 4294901760, %v1663_v4  ;;  %v6783_v14 = vand.u32 4294901760, %v5428_v37  ;;  %v2927_v20 = vsel %vm71_vm13, 1.0, %v6756_v60  ;;  %v1990_v27 = vand.u32 4294901760, %v1989_v61  ;;  %vm6784_vm15 = vmmov %vm6777_vm12 }
  0xc9   :  { %3490 = vmatpush3.msra.mxu1 %v1864_v42  ;;  %2996 = vmatprep.mubr.msk.f32.mxu1 %vm85_vm4, %v6579_v38  ;;  %v6484_v35 = vand.u32 4294901760, %v5514_v3  ;;  %v1878_v4 = vand.u32 4294901760, %v1877_v43  ;;  %v1997_v5 = vand.u32 4294901760, %v1996_v17  ;;  %v1678_v31 = vsub.f32 %v5490_v9, %v6485_v52 }
  0xca   :  { %v1884_v26 = vsub.f32 %v5428_v37, %v6783_v14  ;;  %3491 = vmatprep.subr.mxu1 %v1983_v12  ;;  %1659 = vmatprep.mubr.f32.mxu0 %v1658_v45  ;;  %v2926_v42 = vsel %vm70_vm14, 1.0, %v6756_v60  ;;  %v1673_v55 = vand.u32 4294901760, %v1672_v33  ;;  %v6483_v61 = vand.u32 4294901760, %v5533_v50 }
  0xcb   :  { %3492 = vmatpush3.msra.mxu1 %v1871_v0  ;;  %3524 = vmatprep.subr.mxu0 %v4862_v47  ;;  %v5562_v14 = vsub.f32 %v2927_v20, %v2927_v20  ;;  %vm75_vm4 = vcmp.eq.s32.totalorder %v5210_v63, %v6747_v53  ;;  %v1687_v0 = vsub.f32 %v5514_v3, %v6484_v35  ;;  %v1679_v45 = vand.u32 4294901760, %v1678_v31  ;;  %v6794_v35 = vld [vmem:[#allocation32_spill] sm:$0xff] }
  0xcc   :  { %2997 = vmatmul.mubr.msk.f32.gmra.mxu1 %vm6784_vm15, %v6579_v38  ;;  %1665 = vmatmul.mubr.f32.gmra.mxu0 %v1664_v1  ;;  %v1885_v12 = vand.u32 4294901760, %v1884_v26  ;;  %v5574_v33 = vsub.f32 %v2926_v42, %v2926_v42  ;;  %vm74_vm0 = vcmp.eq.s32.totalorder %v5113_v57, %v6747_v53  ;;  %v2931_v51 = vsel %vm75_vm4, 1.0, %v6756_v60  ;;  %v6829_v53 = vld [vmem:[#allocation29_spill] sm:$0xff] }
  0xcd   :  { %3493 = vmatprep.subr.mxu1 %v1990_v27  ;;  %3525 = vmatpush3.msra.mxu0 %v4871_v2  ;;  %v1693_v43 = vsub.f32 %v5533_v50, %v6483_v61  ;;  %v6482_v17 = vand.u32 4294901760, %v5562_v14  ;;  %v2930_v1 = vsel %vm74_vm0, 1.0, %v6756_v60  ;;  %vm79_vm1 = vcmp.eq.s32.totalorder %v5210_v63, %v6753_v15 }
  0xce   :  { %6785 = vst [vmem:[#allocation63_spill] sm:$0xff] %v5574_v33  ;;  %3494 = vmatpush3.msra.mxu1 %v1878_v4  ;;  %3526 = vmatprep.subr.mxu0 %v4888_v10  ;;  %v1688_v26 = vand.u32 4294901760, %v1687_v0  ;;  %v6481_v20 = vand.u32 4294901760, %v5574_v33  ;;  %v5603_v27 = vsub.f32 %v2931_v51, %v2931_v51  ;;  %vm78_vm2 = vcmp.eq.s32.totalorder %v5113_v57, %v6753_v15 }
  0xcf   :  { %3495 = vmatprep.subr.mxu1 %v1997_v5  ;;  %1674 = vmatprep.mubr.f32.mxu0 %v1673_v55  ;;  %v1694_v4 = vand.u32 4294901760, %v1693_v43  ;;  %v1702_v5 = vsub.f32 %v5562_v14, %v6482_v17  ;;  %v5613_v31 = vsub.f32 %v2930_v1, %v2930_v1  ;;  %v2935_v42 = vsel %vm79_vm1, 1.0, %v6756_v60  ;;  %v6789_v1 = vld [vmem:[#allocation42_spill] sm:$0xff] }
  0xd0   :  { %3496 = vmatpush3.msra.mxu1 %v1885_v12  ;;  %2998 = vmatprep.mubr.msk.f32.mxu1 %vm55_vm3, %v6579_v38  ;;  %6786 = vst [vmem:[#allocation64_spill] sm:$0xff] %v5603_v27  ;;  %v1708_v55 = vsub.f32 %v5574_v33, %v6481_v20  ;;  %v6486_v12 = vand.u32 4294901760, %v5603_v27  ;;  %v2934_v0 = vsel %vm78_vm2, 1.0, %v6756_v60  ;;  %vm83_vm12 = vcmp.eq.s32.totalorder %v5210_v63, %v6764_v11  ;;  %v6804_v33 = vld [vmem:[#allocation34_spill] sm:$0xff] }
  0xd1   :  { %3527 = vmatpush3.msra.mxu0 %v4896_v44  ;;  %2999 = vmatmul.mubr.msk.f32.vlgmr.msra.gmra.mxu1 %vm54_vm5, %v6579_v38  ;;  %6787 = vst [vmem:[#allocation65_spill] sm:$0xff] %v5613_v31  ;;  %v1703_v51 = vand.u32 4294901760, %v1702_v5  ;;  %v6490_v43 = vand.u32 4294901760, %v5613_v31  ;;  %v5646_v20 = vsub.f32 %v2934_v0, %v2934_v0  ;;  %vm82_vm15 = vcmp.eq.s32.totalorder %v5113_v57, %v6764_v11  ;;  %v6795_v0 = vld [vmem:[#allocation10_spill] sm:$0xff] }
  0xd2   :  { %1680 = vmatmul.mubr.f32.gmra.mxu0 %v1679_v45  ;;  %3528 = vmatprep.subr.mxu0 %v4921_v29  ;;  %v5635_v45 = vsub.f32 %v2935_v42, %v2935_v42  ;;  %v6792_v42 = vld [vmem:[#allocation21_spill] sm:$0xff]  ;;  %v1709_v17 = vand.u32 4294901760, %v1708_v55  ;;  %v1717_v5 = vsub.f32 %v5603_v27, %v6486_v12  ;;  %v2939_v61 = vsel %vm83_vm12, 1.0, %v6756_v60 }
  0xd3   :  { %3583 = vmatprep.subr.mxu1 %v4832_v13  ;;  %3529 = vmatpush3.msra.mxu0 %v4929_v25  ;;  %6791 = vst [vmem:[#allocation42_spill] sm:$0xff] %v5646_v20  ;;  %v1723_v55 = vsub.f32 %v5613_v31, %v6490_v43  ;;  %v2938_v12 = vsel %vm82_vm15, 1.0, %v6756_v60  ;;  %v5676_v52 = vsub.f32 %v2939_v61, %v2939_v61  ;;  %v6800_v31 = vld [vmem:[#allocation14_spill] sm:$0xff]  ;;  %v6837_v11 = vand.u32 4294901760, %v4862_v47 }
  0xd4   :  { %3584 = vmatpush3.msra.mxu1 %v4840_v41  ;;  %3530 = vmatprep.subr.mxu0 %v4960_v46  ;;  %6788 = vst [vmem:[#allocation66_spill] sm:$0xff] %v5635_v45  ;;  %v1718_v43 = vand.u32 4294901760, %v1717_v5  ;;  %v6801_v27 = vand.u32 4294901760, %v5635_v45  ;;  %v5689_v61 = vsub.f32 %v2938_v12, %v2938_v12 }
  0xd5   :  { %1689 = vmatprep.mubr.f32.mxu0 %v1688_v26  ;;  %3000 = vmatprep.mubr.msk.f32.mxu1 %vm59_vm6, %v6579_v38  ;;  %v6790_v26 = vld [vmem:[#allocation9_spill] sm:$0xff]  ;;  %v1724_v32 = vand.u32 4294901760, %v1723_v55 }
  0xd6   :  { %3531 = vmatpush3.msra.mxu0 %v4973_v21  ;;  %3585 = vmatprep.subr.mxu1 %v4851_v24  ;;  %6798 = vst [vmem:[#allocation9_spill] sm:$0xff] %v5676_v52  ;;  %6802 = vst [vmem:[#allocation21_spill] sm:$0xff] %v5689_v61 }
  0xd7   :  { %1695 = vmatmul.mubr.f32.gmra.mxu0 %v1694_v4  ;;  %3001 = vmatmul.mubr.msk.f32.gmra.mxu1 %vm6496_vm7, %v6579_v38  ;;  %v6793_v4 = vld [vmem:[#allocation31_spill] sm:$0xff]  ;;  %vm6525_vm7 = vcmp.eq.s32.totalorder %v5113_v57, %v6773_v30 }
  0xd8   :  { %3532 = vmatprep.subr.mxu0 %v6789_v1  ;;  %3586 = vmatpush3.msra.mxu1 %v6790_v26  ;;  %v2942_v55 = vsel %vm6525_vm7, 1.0, %v6756_v60 }
  0xd9   :  { %3533 = vmatpush3.msra.mxu0 %v6792_v42  ;;  %3587 = vmatprep.subr.mxu1 %v6793_v4 }
  0xda   :  { %3534 = vmatprep.subr.mxu0 %v6794_v35  ;;  %3588 = vmatpush3.msra.mxu1 %v6795_v0 }
  0xdb   :  { %1704 = vmatprep.mubr.f32.mxu0 %v1703_v51  ;;  %3002 = vmatprep.mubr.msk.f32.mxu1 %vm6489_vm8, %v6579_v38  ;;  %vm6526_vm8 = vcmp.eq.s32.totalorder %v5210_v63, %v6773_v30  ;;  %v1732_v51 = vsub.f32 %v5635_v45, %v6801_v27  ;;  %v6807_v27 = vand.u32 4294901760, %v5646_v20 }
  0xdc   :  { %3535 = vmatpush3.msra.mxu0 %v6796_v22  ;;  %3589 = vmatprep.subr.mxu1 %v6797_v34  ;;  %v2943_v5 = vsel %vm6526_vm8, 1.0, %v6756_v60  ;;  %v5727_v34 = vsub.f32 %v2942_v55, %v2942_v55 }
  0xdd   :  { %1710 = vmatmul.mubr.f32.gmra.mxu0 %v1709_v17  ;;  %3003 = vmatmul.mubr.msk.f32.gmra.mxu1 %vm62_vm9, %v6579_v38  ;;  %v6803_v17 = vld [vmem:[#allocation8_spill] sm:$0xff]  ;;  %v1738_v12 = vsub.f32 %v5646_v20, %v6807_v27  ;;  %v1733_v27 = vand.u32 4294901760, %v1732_v51  ;;  %v5719_v45 = vsub.f32 %v2943_v5, %v2943_v5  ;;  %v6809_v20 = vld [vmem:[#allocation50_spill] sm:$0xff]  ;;  %v6816_v5 = vld [vmem:[#allocation23_spill] sm:$0xff] }
  0xde   :  { %3536 = vmatprep.subr.mxu0 %v6799_v19  ;;  %3590 = vmatpush3.msra.mxu1 %v6800_v31  ;;  %v6805_v31 = vld [vmem:[#allocation7_spill] sm:$0xff]  ;;  %v6806_v19 = vld [vmem:[#allocation16_spill] sm:$0xff]  ;;  %6813 = vst [vmem:[#allocation31_spill] sm:$0xff] %v5727_v34 }
  0xdf   :  { %3537 = vmatpush3.msra.mxu0 %v6803_v17  ;;  %3591 = vmatprep.subr.mxu1 %v6804_v33  ;;  %v6811_v33 = vld [vmem:[#allocation48_spill] sm:$0xff]  ;;  %v1739_v60 = vand.u32 4294901760, %v1738_v12  ;;  %v6818_v12 = vld [vmem:[#allocation43_spill] sm:$0xff] }
  0xe0   :  { %3538 = vmatprep.subr.mxu0 %v6805_v31  ;;  %3592 = vmatpush3.msra.mxu1 %v6806_v19  ;;  %v6808_v31 = vld [vmem:[#allocation11_spill] sm:$0xff]  ;;  %v6810_v19 = vld [vmem:[#allocation40_spill] sm:$0xff] }
  0xe1   :  { %1719 = vmatprep.mubr.f32.mxu0 %v1718_v43  ;;  %3004 = vmatprep.mubr.msk.f32.mxu1 %vm67_vm10, %v6579_v38  ;;  %v6507_v43 = vand.u32 4294901760, %v5689_v61  ;;  %v6815_v51 = vld [vmem:[#allocation56_spill] sm:$0xff] }
  0xe2   :  { %3539 = vmatpush3.msra.mxu0 %v6808_v31  ;;  %3005 = vmatmul.mubr.msk.f32.gmra.mxu1 %vm66_vm11, %v6579_v38  ;;  %v6812_v31 = vand.u32 4294901760, %v5676_v52 }
  0xe3   :  { %1725 = vmatmul.mubr.f32.gmra.mxu0 %v1724_v32  ;;  %3540 = vmatprep.subr.mxu0 %v6809_v20  ;;  %v1753_v32 = vsub.f32 %v5689_v61, %v6507_v43  ;;  %v6820_v43 = vld [vmem:[#allocation36_spill] sm:$0xff]  ;;  %v6821_v61 = vand.u32 4294901760, %v5719_v45 }
  0xe4   :  { %3593 = vmatprep.subr.mxu1 %v6810_v19  ;;  %3541 = vmatpush3.msra.mxu0 %v6811_v33  ;;  %v1747_v17 = vsub.f32 %v5676_v52, %v6812_v31  ;;  %v6817_v31 = vld [vmem:[#allocation51_spill] sm:$0xff]  ;;  %v6511_v52 = vand.u32 4294901760, %v5727_v34 }
  0xe5   :  { %3594 = vmatpush3.msra.mxu1 %v6814_v62  ;;  %3542 = vmatprep.subr.mxu0 %v6815_v51  ;;  %v1754_v33 = vand.u32 4294901760, %v1753_v32  ;;  %v6824_v32 = vld [vmem:[#allocation33_spill] sm:$0xff] }
  0xe6   :  { %3595 = vmatprep.subr.mxu1 %v6816_v5  ;;  %1734 = vmatprep.mubr.f32.mxu0 %v1733_v27  ;;  %v1748_v55 = vand.u32 4294901760, %v1747_v17  ;;  %v6819_v27 = vld [vmem:[#allocation25_spill] sm:$0xff]  ;;  %v1768_v16 = vsub.f32 %v5727_v34, %v6511_v52  ;;  %v6826_v34 = vld [vmem:[#allocation15_spill] sm:$0xff] }
  0xe7   :  { %3006 = vmatprep.mubr.msk.f32.mxu1 %vm71_vm13, %v6579_v38  ;;  %3543 = vmatpush3.msra.mxu0 %v6817_v31  ;;  %v6823_v17 = vld [vmem:[#allocation13_spill] sm:$0xff] }
  0xe8   :  { %3596 = vmatpush3.msra.mxu1 %v6818_v12  ;;  %1740 = vmatmul.mubr.f32.gmra.mxu0 %v1739_v60  ;;  %v1762_v12 = vsub.f32 %v5719_v45, %v6821_v61  ;;  %v6822_v60 = vld [vmem:[#allocation24_spill] sm:$0xff]  ;;  %v1769_v52 = vand.u32 4294901760, %v1768_v16 }
  0xe9   :  { %3007 = vmatmul.mubr.msk.f32.gmra.mxu1 %vm70_vm14, %v6579_v38  ;;  %3544 = vmatprep.subr.mxu0 %v5242_v18 }
  0xea   :  { %3597 = vmatprep.subr.mxu1 %v6819_v27  ;;  %3545 = vmatpush3.msra.mxu0 %v6820_v43  ;;  %v1763_v61 = vand.u32 4294901760, %v1762_v12  ;;  %v6828_v12 = vld [vmem:[#allocation18_spill] sm:$0xff] }
  0xeb   :  { %3598 = vmatpush3.msra.mxu1 %v6822_v60  ;;  %3546 = vmatprep.subr.mxu0 %v5292_v59 }
  0xec   :  { %3599 = vmatprep.subr.mxu1 %v6823_v17  ;;  %1749 = vmatprep.mubr.f32.mxu0 %v1748_v55  ;;  %v6825_v55 = vld [vmem:[#allocation19_spill] sm:$0xff] }
  0xed   :  { %3008 = vmatprep.mubr.msk.f32.mxu1 %vm75_vm4, %v6579_v38  ;;  %3547 = vmatpush3.msra.mxu0 %v5254_v36 }
  0xee   :  { %3600 = vmatpush3.msra.mxu1 %v6824_v32  ;;  %1755 = vmatmul.mubr.f32.gmra.mxu0 %v1754_v33  ;;  %v6827_v33 = vld [vmem:[#allocation52_spill] sm:$0xff] }
  0xef   :  { %3009 = vmatmul.mubr.msk.f32.gmra.mxu1 %vm74_vm0, %v6579_v38  ;;  %3548 = vmatprep.subr.mxu0 %v5295_v23 }
  0xf0   :  { %3549 = vmatpush3.msra.mxu0 %v5263_v48  ;;  %3601 = vmatprep.subr.mxu1 %v6825_v55 }
  0xf1   :  { %3550 = vmatprep.subr.mxu0 %v5371_v6  ;;  %3602 = vmatpush3.msra.mxu1 %v6826_v34 }
  0xf2   :  { %1764 = vmatprep.mubr.f32.mxu0 %v1763_v61  ;;  %3010 = vmatprep.mubr.msk.f32.mxu1 %vm79_vm1, %v6579_v38 }
  0xf3   :  { %3551 = vmatpush3.msra.mxu0 %v5320_v40  ;;  %3603 = vmatprep.subr.mxu1 %v5178_v8 }
  0xf4   :  { %1770 = vmatmul.mubr.f32.gmra.mxu0 %v1769_v52  ;;  %3011 = vmatmul.mubr.msk.f32.gmra.mxu1 %vm78_vm2, %v6579_v38  ;;  %v3084_v16 = vpop.f32.mrf.mxu0 }
  0xf5   :  { %3552 = vmatprep.subr.mxu0 %v5434_v49  ;;  %3604 = vmatpush3.msra.mxu1 %v6827_v33  ;;  %v6830_v49 = vld [vmem:[#allocation45_spill] sm:$0xff]  ;;  %v6831_v33 = vld [vmem:[#allocation58_spill] sm:$0xff] }
  0xf6   :  { %3553 = vmatpush3.msra.mxu0 %v5387_v54  ;;  %3605 = vmatprep.subr.mxu1 %v6828_v12  ;;  %v3085_v61 = vpop.f32.mrf.mxu0  ;;  %v6835_v12 = vld [vmem:[#allocation30_spill] sm:$0xff]  ;;  %v6836_v54 = vld [vmem:[#allocation59_spill] sm:$0xff] }
  0xf7   :  { %3554 = vmatprep.subr.mxu0 %v5443_v7  ;;  %3606 = vmatpush3.msra.mxu1 %v6829_v53  ;;  %v3086_v52 = vadd.f32 %v3085_v61, %v3084_v16  ;;  %v6832_v7 = vld [vmem:[#allocation28_spill] sm:$0xff]  ;;  %v6833_v61 = vld [vmem:[#allocation57_spill] sm:$0xff] }
  0xf8   :  { %3012 = vmatprep.mubr.msk.f32.mxu1 %vm83_vm12, %v6579_v38  ;;  %3555 = vmatpush3.msra.mxu0 %v5428_v37  ;;  %v3087_v15 = vpop.f32.mrf.mxu0  ;;  %v6834_v53 = vld [vmem:[#allocation60_spill] sm:$0xff] }
  0xf9   :  { %2193 = vmatprep.mubr.f32.mxu0 %v6830_v49  ;;  %3607 = vmatprep.subr.mxu1 %v6831_v33 }
  0xfa   :  { %3013 = vmatmul.mubr.msk.f32.gmra.mxu1 %vm82_vm15, %v6579_v38  ;;  %2196 = vmatmul.mubr.f32.vlgmr.msra.gmra.mxu0 %v6832_v7  ;;  %v3088_v16 = vpop.f32.mrf.mxu0 }
  0xfb   :  { %3608 = vmatpush3.msra.mxu1 %v6833_v61  ;;  %3014 = vmatprep.mubr.msk.f32.mxu1 %vm6526_vm8, %v6579_v38  ;;  %v3089_v37 = vadd.f32 %v3088_v16, %v3087_v15  ;;  %v6838_v15 = vand.u32 4294901760, %v4871_v2 }
  0xfc   :  { %3609 = vmatprep.subr.mxu1 %v6834_v53  ;;  %2202 = vmatprep.mubr.f32.mxu0 %v6835_v12  ;;  %v3143_v33 = vpop.f32.mrf.mxu1  ;;  %v6839_v53 = vld [vmem:[#allocation26_spill] sm:$0xff] }
  0xfd   :  { %3610 = vmatpush3.msra.mxu1 %v6836_v54  ;;  %3642 = vmatprep.subr.mxu0 %v6837_v11  ;;  %v6840_v54 = vand.u32 4294901760, %v4888_v10  ;;  %v6841_v11 = vld [vmem:[#allocation27_spill] sm:$0xff]  ;;  %v6844_v10 = vand.u32 4294901760, %v6832_v7  ;;  %v6848_v7 = vand.u32 4294901760, %v6835_v12 }
  0xfe   :  { %3015 = vmatmul.mubr.msk.f32.gmra.mxu1 %vm6525_vm7, %v6579_v38  ;;  %2205 = vmatmul.mubr.f32.gmra.mxu0 %v5414_v56  ;;  %v3144_v61 = vpop.f32.mrf.mxu1 }
  0xff   :  { %3611 = vmatprep.subr.mxu1 %v5307_v39  ;;  %3643 = vmatpush3.msra.mxu0 %v6838_v15  ;;  %v3145_v16 = vadd.f32 %v3144_v61, %v3143_v33  ;;  %v6842_v39 = vand.u32 4294901760, %v6830_v49  ;;  %v6843_v33 = vand.u32 4294901760, %v4896_v44  ;;  %v6845_v15 = vand.u32 4294901760, %v4921_v29 }
 0x100   :  { %3612 = vmatpush3.msra.mxu1 %v6839_v53  ;;  %3644 = vmatprep.subr.mxu0 %v6840_v54  ;;  %v3146_v47 = vpop.f32.mrf.mxu1  ;;  %v3090_v30 = vpop.f32.mrf.mxu0  ;;  %v6846_v49 = vand.u32 4294901760, %v4929_v25  ;;  %v6847_v44 = vand.u32 4294901760, %v4960_v46 }
 0x101   :  { %3613 = vmatprep.subr.mxu1 %v6841_v11  ;;  %2211 = vmatprep.mubr.f32.mxu0 %v5449_v28  ;;  %v5825_v57 = vadd.f32 %v3145_v16, %v3086_v52 }
 0x102   :  { %3614 = vmatpush3.msra.mxu1 %v5365_v58  ;;  %2372 = vmatprep.mubr.f32.mxu1 %v6842_v39  ;;  %v3147_v2 = vpop.f32.mrf.mxu1  ;;  %v3091_v54 = vpop.f32.mrf.mxu0 }
 0x103   :  { %3645 = vmatpush3.msra.mxu0 %v6843_v33  ;;  %2376 = vmatmul.mubr.f32.vlgmr.msra.gmra.mxu1 %v6844_v10  ;;  %v3148_v61 = vadd.f32 %v3147_v2, %v3146_v47  ;;  %v3092_v52 = vadd.f32 %v3091_v54, %v3090_v30  ;;  %v6851_v47 = vand.u32 4294901760, %v6789_v1  ;;  %v6852_v2 = vand.u32 4294901760, %v6792_v42 }
 0x104   :  { %2214 = vmatmul.mubr.f32.gmra.mxu0 %v5490_v9  ;;  %3646 = vmatprep.subr.mxu0 %v6845_v15  ;;  %v3093_v39 = vpop.f32.mrf.mxu0  ;;  %v6854_v1 = vand.u32 4294901760, %v5449_v28  ;;  %v6855_v42 = vand.u32 4294901760, %v6796_v22  ;;  %v6864_v22 = vld [vmem:[#allocation34_spill] sm:$0xff] }
 0x105   :  { %3701 = vmatprep.subr.mxu1 %v4832_v13  ;;  %3647 = vmatpush3.msra.mxu0 %v6846_v49  ;;  %v5840_v16 = vadd.f32 %v3148_v61, %v3089_v37  ;;  %v6849_v13 = vand.u32 4294901760, %v4973_v21  ;;  %v6853_v21 = vand.u32 4294901760, %v6794_v35  ;;  %v6857_v35 = vld [vmem:[#allocation63_spill] sm:$0xff] }
 0x106   :  { %3702 = vmatpush3.msra.mxu1 %v4840_v41  ;;  %3648 = vmatprep.subr.mxu0 %v6847_v44  ;;  %v3094_v29 = vpop.f32.mrf.mxu0  ;;  %v3149_v30 = vpop.f32.mrf.mxu1  ;;  %v6850_v41 = vand.u32 4294901760, %v5414_v56  ;;  %v6862_v44 = vld [vmem:[#allocation8_spill] sm:$0xff] }
 0x107   :  { %2220 = vmatprep.mubr.f32.mxu0 %v5514_v3  ;;  %2383 = vmatprep.mubr.f32.mxu1 %v6848_v7  ;;  %v3095_v25 = vadd.f32 %v3094_v29, %v3093_v39  ;;  %v6861_v39 = vld [vmem:[#allocation14_spill] sm:$0xff]  ;;  %v6863_v7 = vand.u32 4294901760, %v6862_v44  ;;  %v6886_v44 = vand.u32 4294901760, %v5292_v59 }
 0x108   :  { %3649 = vmatpush3.msra.mxu0 %v6849_v13  ;;  %3703 = vmatprep.subr.mxu1 %v4851_v24  ;;  %v3150_v37 = vpop.f32.mrf.mxu1 }
 0x109   :  { %2223 = vmatmul.mubr.f32.gmra.mxu0 %v5533_v50  ;;  %2387 = vmatmul.mubr.f32.gmra.mxu1 %v6850_v41  ;;  %v3096_v46 = vpop.f32.mrf.mxu0  ;;  %v3151_v12 = vadd.f32 %v3150_v37, %v3149_v30  ;;  %v6865_v30 = vld [vmem:[#allocation7_spill] sm:$0xff]  ;;  %v6869_v37 = vand.u32 4294901760, %v5514_v3 }
 0x10a   :  { %3650 = vmatprep.subr.mxu0 %v6851_v47  ;;  %3704 = vmatpush3.msra.mxu1 %v6790_v26  ;;  %v6866_v13 = vand.u32 4294901760, %v6865_v30 }
 0x10b   :  { %3651 = vmatpush3.msra.mxu0 %v6852_v2  ;;  %3705 = vmatprep.subr.mxu1 %v6793_v4  ;;  %v3097_v24 = vpop.f32.mrf.mxu0  ;;  %v5863_v33 = vadd.f32 %v3151_v12, %v3092_v52  ;;  %v6856_v4 = vld [vmem:[#allocation12_spill] sm:$0xff]  ;;  %v6859_v52 = vld [vmem:[#allocation6_spill] sm:$0xff]  ;;  %v6870_v12 = vld [vmem:[#allocation11_spill] sm:$0xff] }
 0x10c   :  { %3652 = vmatprep.subr.mxu0 %v6853_v21  ;;  %3706 = vmatpush3.msra.mxu1 %v6795_v0  ;;  %v3098_v56 = vadd.f32 %v3097_v24, %v3096_v46  ;;  %v3152_v10 = vpop.f32.mrf.mxu1  ;;  %v6858_v0 = vand.u32 4294901760, %v5490_v9  ;;  %v6860_v49 = vand.u32 4294901760, %v6859_v52  ;;  %v6867_v9 = vld [vmem:[#allocation16_spill] sm:$0xff]  ;;  %v6871_v2 = vand.u32 4294901760, %v6870_v12  ;;  %v6873_v21 = vld [vmem:[#allocation65_spill] sm:$0xff]  ;;  %v6881_v52 = vld [vmem:[#allocation43_spill] sm:$0xff] }
 0x10d   :  { %2229 = vmatprep.mubr.f32.mxu0 %v5562_v14  ;;  %2394 = vmatprep.mubr.f32.mxu1 %v6854_v1  ;;  %v3099_v26 = vpop.f32.mrf.mxu0  ;;  %v6868_v46 = vld [vmem:[#allocation64_spill] sm:$0xff]  ;;  %v6872_v24 = vand.u32 4294901760, %v5533_v50  ;;  %v6878_v50 = vld [vmem:[#allocation66_spill] sm:$0xff]  ;;  %v6899_v12 = vld [vmem:[#allocation39_spill] sm:$0xff] }
 0x10e   :  { %3653 = vmatpush3.msra.mxu0 %v6855_v42  ;;  %3707 = vmatprep.subr.mxu1 %v6856_v4  ;;  %v3153_v54 = vpop.f32.mrf.mxu1  ;;  %v6875_v42 = vld [vmem:[#allocation48_spill] sm:$0xff]  ;;  %v6888_v30 = vand.u32 4294901760, %v6868_v46 }
 0x10f   :  { %2232 = vmatmul.mubr.f32.gmra.mxu0 %v6857_v35  ;;  %2398 = vmatmul.mubr.f32.gmra.mxu1 %v6858_v0  ;;  %v3100_v61 = vpop.f32.mrf.mxu0  ;;  %v3154_v15 = vadd.f32 %v3153_v54, %v3152_v10  ;;  %v6874_v10 = vand.u32 4294901760, %v6809_v20  ;;  %v6876_v3 = vand.u32 4294901760, %v6875_v42  ;;  %v6877_v54 = vand.u32 4294901760, %v6815_v51  ;;  %v6905_v42 = vld [vmem:[#allocation62_spill] sm:$0xff] }
 0x110   :  { %3654 = vmatprep.subr.mxu0 %v6860_v49  ;;  %3708 = vmatpush3.msra.mxu1 %v6861_v39  ;;  %v3101_v28 = vadd.f32 %v3100_v61, %v3099_v26  ;;  %v6879_v61 = vand.u32 4294901760, %v5562_v14  ;;  %v6883_v49 = vand.u32 4294901760, %v6857_v35  ;;  %v6885_v14 = vand.u32 4294901760, %v6820_v43  ;;  %v6887_v35 = vld [vmem:[#allocation9_spill] sm:$0xff] }
 0x111   :  { %3655 = vmatpush3.msra.mxu0 %v6863_v7  ;;  %3709 = vmatprep.subr.mxu1 %v6864_v22  ;;  %v5880_v29 = vadd.f32 %v3154_v15, %v3095_v25  ;;  %v6889_v43 = vand.u32 4294901760, %v5254_v36  ;;  %v6894_v36 = vand.u32 4294901760, %v5371_v6 }
 0x112   :  { %3656 = vmatprep.subr.mxu0 %v6866_v13  ;;  %3710 = vmatpush3.msra.mxu1 %v6867_v9  ;;  %v3102_v41 = vpop.f32.mrf.mxu0  ;;  %v3155_v47 = vpop.f32.mrf.mxu1 }
 0x113   :  { %2238 = vmatprep.mubr.f32.mxu0 %v6868_v46  ;;  %2405 = vmatprep.mubr.f32.mxu1 %v6869_v37  ;;  %v6895_v46 = vand.u32 4294901760, %v6878_v50 }
 0x114   :  { %3657 = vmatpush3.msra.mxu0 %v6871_v2  ;;  %2409 = vmatmul.mubr.f32.gmra.mxu1 %v6872_v24  ;;  %v3103_v25 = vpop.f32.mrf.mxu0  ;;  %v3156_v26 = vpop.f32.mrf.mxu1  ;;  %v6900_v2 = vand.u32 4294901760, %v6899_v12  ;;  %v6901_v24 = vld [vmem:[#allocation52_spill] sm:$0xff] }
 0x115   :  { %2241 = vmatmul.mubr.f32.gmra.mxu0 %v6873_v21  ;;  %3658 = vmatprep.subr.mxu0 %v6874_v10  ;;  %v3104_v1 = vadd.f32 %v3103_v25, %v3102_v41  ;;  %v3157_v4 = vadd.f32 %v3156_v26, %v3155_v47  ;;  %v6893_v41 = vand.u32 4294901760, %v5263_v48  ;;  %v6896_v47 = vand.u32 4294901760, %v5320_v40  ;;  %v6897_v48 = vld [vmem:[#allocation31_spill] sm:$0xff]  ;;  %v6904_v40 = vld [vmem:[#allocation18_spill] sm:$0xff] }
 0x116   :  { %3711 = vmatprep.subr.mxu1 %v6810_v19  ;;  %3659 = vmatpush3.msra.mxu0 %v6876_v3  ;;  %v6880_v19 = vand.u32 4294901760, %v6817_v31  ;;  %v6902_v10 = vld [vmem:[#allocation35_spill] sm:$0xff]  ;;  %v6906_v3 = vand.u32 4294901760, %v6905_v42 }
 0x117   :  { %3712 = vmatpush3.msra.mxu1 %v6814_v62  ;;  %3660 = vmatprep.subr.mxu0 %v6877_v54  ;;  %v5903_v0 = vadd.f32 %v3157_v4, %v3098_v56  ;;  %v6882_v62 = vld [vmem:[#allocation42_spill] sm:$0xff]  ;;  %v6907_v4 = vld [vmem:[#allocation29_spill] sm:$0xff] }
 0x118   :  { %3713 = vmatprep.subr.mxu1 %v6816_v5  ;;  %2247 = vmatprep.mubr.f32.mxu0 %v6878_v50  ;;  %v3105_v20 = vpop.f32.mrf.mxu0  ;;  %v3158_v15 = vpop.f32.mrf.mxu1  ;;  %v6884_v5 = vand.u32 4294901760, %v5242_v18  ;;  %v6898_v6 = vand.u32 4294901760, %v6882_v62 }
 0x119   :  { %2416 = vmatprep.mubr.f32.mxu1 %v6879_v61  ;;  %3661 = vmatpush3.msra.mxu0 %v6880_v19  ;;  %v6909_v61 = vld [vmem:[#allocation37_spill] sm:$0xff] }
 0x11a   :  { %3714 = vmatpush3.msra.mxu1 %v6881_v52  ;;  %2250 = vmatmul.mubr.f32.gmra.mxu0 %v6882_v62  ;;  %v3106_v51 = vpop.f32.mrf.mxu0  ;;  %v3159_v39 = vpop.f32.mrf.mxu1  ;;  %v6910_v19 = vand.u32 4294901760, %v6909_v61 }
 0x11b   :  { %2420 = vmatmul.mubr.f32.gmra.mxu1 %v6883_v49  ;;  %3662 = vmatprep.subr.mxu0 %v6884_v5  ;;  %v3107_v56 = vadd.f32 %v3106_v51, %v3105_v20  ;;  %v3160_v31 = vadd.f32 %v3159_v39, %v3158_v15  ;;  %v6908_v20 = vand.u32 4294901760, %v6887_v35  ;;  %v6912_v51 = vld [vmem:[#allocation58_spill] sm:$0xff]  ;;  %v6915_v39 = vld [vmem:[#allocation57_spill] sm:$0xff] }
 0x11c   :  { %3715 = vmatprep.subr.mxu1 %v6819_v27  ;;  %3663 = vmatpush3.msra.mxu0 %v6885_v14  ;;  %v6890_v27 = vld [vmem:[#allocation21_spill] sm:$0xff]  ;;  %v6916_v14 = vand.u32 4294901760, %v5719_v45 }
 0x11d   :  { %3716 = vmatpush3.msra.mxu1 %v6822_v60  ;;  %3664 = vmatprep.subr.mxu0 %v6886_v44  ;;  %v5923_v7 = vadd.f32 %v3160_v31, %v3101_v28  ;;  %v3108_v18 = vpop.f32.mrf.mxu0  ;;  %v6892_v28 = vand.u32 4294901760, %v5295_v23 }
 0x11e   :  { %3717 = vmatprep.subr.mxu1 %v6823_v17  ;;  %2256 = vmatprep.mubr.f32.mxu0 %v6887_v35  ;;  %v3161_v22 = vpop.f32.mrf.mxu1  ;;  %v6891_v17 = vand.u32 4294901760, %v6873_v21 }
 0x11f   :  { %2427 = vmatprep.mubr.f32.mxu1 %v6888_v30  ;;  %3665 = vmatpush3.msra.mxu0 %v6889_v43  ;;  %v3109_v59 = vpop.f32.mrf.mxu0  ;;  %v6919_v43 = vld [vmem:[#allocation59_spill] sm:$0xff] }
 0x120   :  { %3718 = vmatpush3.msra.mxu1 %v6824_v32  ;;  %2259 = vmatmul.mubr.f32.gmra.mxu0 %v6890_v27  ;;  %v3162_v60 = vpop.f32.mrf.mxu1  ;;  %v3110_v13 = vadd.f32 %v3109_v59, %v3108_v18  ;;  %v6917_v18 = vld [vmem:[#allocation60_spill] sm:$0xff]  ;;  %v6920_v59 = vand.u32 4294901760, %v6897_v48 }
 0x121   :  { %2431 = vmatmul.mubr.f32.gmra.mxu1 %v6891_v17  ;;  %3666 = vmatprep.subr.mxu0 %v6892_v28  ;;  %v3163_v9 = vadd.f32 %v3162_v60, %v3161_v22  ;;  %v6918_v22 = vld [vmem:[#allocation41_spill] sm:$0xff]  ;;  %v6923_v17 = vld [vmem:[#allocation44_spill] sm:$0xff] }
 0x122   :  { %3667 = vmatpush3.msra.mxu0 %v6893_v41  ;;  %3719 = vmatprep.subr.mxu1 %v6825_v55  ;;  %v6922_v60 = vld [vmem:[#allocation61_spill] sm:$0xff]  ;;  %vm6924_vm8 = vcmp.eq.s32.totalorder %v5210_v63, %v6923_v17 }
 0x123   :  { %3668 = vmatprep.subr.mxu0 %v6894_v36  ;;  %3720 = vmatpush3.msra.mxu1 %v6826_v34  ;;  %v5941_v32 = vadd.f32 %v3163_v9, %v3104_v1  ;;  %v3164_v23 = vpop.f32.mrf.mxu1  ;;  %v6903_v1 = vand.u32 4294901760, %v6902_v10 }
 0x124   :  { %2265 = vmatprep.mubr.f32.mxu0 %v5719_v45  ;;  %2438 = vmatprep.mubr.f32.mxu1 %v6895_v46  ;;  %v3202_v37 = vpop.f32.mrf.mxu0 }
 0x125   :  { %3669 = vmatpush3.msra.mxu0 %v6896_v47  ;;  %3721 = vmatprep.subr.mxu1 %v5178_v8  ;;  %v3165_v34 = vpop.f32.mrf.mxu1 }
 0x126   :  { %2268 = vmatmul.mubr.f32.gmra.mxu0 %v6897_v48  ;;  %2442 = vmatmul.mubr.f32.gmra.mxu1 %v6898_v6  ;;  %v3203_v55 = vpop.f32.mrf.mxu0  ;;  %v3166_v25 = vadd.f32 %v3165_v34, %v3164_v23 }
 0x127   :  { %3670 = vmatprep.subr.mxu0 %v6900_v2  ;;  %3722 = vmatpush3.msra.mxu1 %v6901_v24  ;;  %v3204_v21 = vadd.f32 %v3203_v55, %v3202_v37  ;;  %v3167_v8 = vpop.f32.mrf.mxu1 }
 0x128   :  { %3671 = vmatpush3.msra.mxu0 %v6903_v1  ;;  %3723 = vmatprep.subr.mxu1 %v6904_v40  ;;  %v3205_v26 = vpop.f32.mrf.mxu0  ;;  %v5961_v54 = vadd.f32 %v3166_v25, %v3107_v56  ;;  %v6913_v56 = vand.u32 4294901760, %v6890_v27 }
 0x129   :  { %3672 = vmatprep.subr.mxu0 %v6906_v3  ;;  %3724 = vmatpush3.msra.mxu1 %v6907_v4  ;;  %v888_v50 = vadd.f32 %v3204_v21, %v5825_v57  ;;  %v3168_v15 = vpop.f32.mrf.mxu1  ;;  %v6914_v57 = vld [vmem:[#allocation17_spill] sm:$0xff] }
 0x12a   :  { %2449 = vmatprep.mubr.f32.mxu1 %v6908_v20  ;;  %3673 = vmatpush3.msra.mxu0 %v6910_v19  ;;  %v3206_v52 = vpop.f32.mrf.mxu0  ;;  %v3169_v49 = vadd.f32 %v3168_v15, %v3167_v8  ;;  %vm6921_vm7 = vcmp.eq.s32.totalorder %v6914_v57, %v6918_v22 }
 0x12b   :  { %3016 = vmatprep.mubr.msk.f32.mxu0 %vm55_vm3, %v6579_v38  ;;  %3725 = vmatprep.subr.mxu1 %v6912_v51  ;;  %v3207_v5 = vadd.f32 %v3206_v52, %v3205_v26  ;;  %v6932_v52 = vld [vmem:[#allocation55_spill] sm:$0xff] }
 0x12c   :  { %2453 = vmatmul.mubr.f32.gmra.mxu1 %v6913_v56  ;;  %3017 = vmatmul.mubr.msk.f32.vlgmr.msra.gmra.mxu0 %vm54_vm5, %v6579_v38  ;;  %v5982_v31 = vadd.f32 %v3169_v49, %v3110_v13 }
 0x12d   :  { %3726 = vmatpush3.msra.mxu1 %v6915_v39  ;;  %2460 = vmatprep.mubr.f32.mxu1 %v6916_v14  ;;  %v897_v44 = vadd.f32 %v3207_v5, %v5840_v16  ;;  %v3261_v35 = vpop.f32.mrf.mxu1  ;;  %v3208_v30 = vpop.f32.mrf.mxu0 }
 0x12e   :  { %3727 = vmatprep.subr.mxu1 %v6917_v18  ;;  %3018 = vmatprep.mubr.msk.f32.mxu0 %vm59_vm6, %v6579_v38 }
 0x12f   :  { %3728 = vmatpush3.msra.mxu1 %v6919_v43  ;;  %v3262_v27 = vpop.f32.mrf.mxu1  ;;  %v3209_v45 = vpop.f32.mrf.mxu0 }
 0x130   :  { %2464 = vmatmul.mubr.f32.gmra.mxu1 %v6920_v59  ;;  %3019 = vmatmul.mubr.msk.f32.gmra.mxu0 %vm6921_vm7, %v6579_v38  ;;  %v3263_v16 = vadd.f32 %v3262_v27, %v3261_v35  ;;  %v3210_v28 = vadd.f32 %v3209_v45, %v3208_v30 }
 0x131   :  { %3729 = vmatprep.subr.mxu1 %v6922_v60  ;;  %3020 = vmatprep.mubr.msk.f32.mxu0 %vm6924_vm8, %v6579_v38 }
 0x132   :  { %3730 = vmatpush3.msra.mxu1 %v6839_v53  ;;  %3034 = vmatprep.mubr.msk.f32.mxu1 %vm55_vm3, %v6579_v38  ;;  %v6007_v13 = vadd.f32 %v3263_v16, %v888_v50  ;;  %v906_v9 = vadd.f32 %v3210_v28, %v5863_v33  ;;  %v3211_v41 = vpop.f32.mrf.mxu0  ;;  %vm6926_vm3 = vmmov %vm6921_vm7  ;;  %vm6934_vm7 = vcmp.eq.s32.totalorder %v6914_v57, %v6932_v52 }
 0x133   :  { %3731 = vmatprep.subr.mxu1 %v6841_v11  ;;  %v3264_v36 = vpop.f32.mrf.mxu1 }
 0x134   :  { %3732 = vmatpush3.msra.mxu1 %v5365_v58  ;;  %3021 = vmatmul.mubr.msk.f32.gmra.mxu0 %vm62_vm9, %v6579_v38  ;;  %v3212_v11 = vpop.f32.mrf.mxu0 }
 0x135   :  { %3035 = vmatmul.mubr.msk.f32.vlgmr.msra.gmra.mxu1 %vm54_vm5, %v6579_v38  ;;  %3022 = vmatprep.mubr.msk.f32.mxu0 %vm67_vm10, %v6579_v38  ;;  %v3265_v33 = vpop.f32.mrf.mxu1  ;;  %v3213_v58 = vadd.f32 %v3212_v11, %v3211_v41  ;;  %vm6928_vm5 = vmmov %vm6924_vm8 }
 0x136   :  { %3036 = vmatprep.mubr.msk.f32.mxu1 %vm59_vm6, %v6579_v38  ;;  %v3266_v46 = vadd.f32 %v3265_v33, %v3264_v36  ;;  %vm6933_vm6 = vcmp.eq.s32.totalorder %v5210_v63, %v6932_v52 }
 0x137   :  { %v915_v23 = vadd.f32 %v3213_v58, %v5880_v29  ;;  %vm6935_vm8 = vmmov %vm6933_vm6 }
 0x138   :  { %3023 = vmatmul.mubr.msk.f32.gmra.mxu0 %vm66_vm11, %v6579_v38  ;;  %v6033_v37 = vadd.f32 %v3266_v46, %v897_v44  ;;  %v3214_v48 = vpop.f32.mrf.mxu0 }
 0x139   :  { %3037 = vmatmul.mubr.msk.f32.gmra.mxu1 %vm6926_vm3, %v6579_v38  ;;  %3024 = vmatprep.mubr.msk.f32.mxu0 %vm71_vm13, %v6579_v38  ;;  %v3267_v6 = vpop.f32.mrf.mxu1 }
 0x13a   :  { %3038 = vmatprep.mubr.msk.f32.mxu1 %vm6928_vm5, %v6579_v38  ;;  %v3215_v29 = vpop.f32.mrf.mxu0 }
 0x13b   :  { %v3268_v34 = vpop.f32.mrf.mxu1  ;;  %v3216_v55 = vadd.f32 %v3215_v29, %v3214_v48 }
 0x13c   :  { %3025 = vmatmul.mubr.msk.f32.gmra.mxu0 %vm70_vm14, %v6579_v38  ;;  %v3269_v12 = vadd.f32 %v3268_v34, %v3267_v6 }
 0x13d   :  { %3039 = vmatmul.mubr.msk.f32.gmra.mxu1 %vm62_vm9, %v6579_v38  ;;  %3026 = vmatprep.mubr.msk.f32.mxu0 %vm75_vm4, %v6579_v38  ;;  %v924_v24 = vadd.f32 %v3216_v55, %v5903_v0  ;;  %vm6936_vm9 = vmmov %vm6934_vm7 }
 0x13e   :  { %3040 = vmatprep.mubr.msk.f32.mxu1 %vm67_vm10, %v6579_v38  ;;  %v6064_v25 = vadd.f32 %v3269_v12, %v906_v9  ;;  %v3270_v21 = vpop.f32.mrf.mxu1  ;;  %v3217_v10 = vpop.f32.mrf.mxu0 }
 0x140   :  { %3027 = vmatmul.mubr.msk.f32.gmra.mxu0 %vm74_vm0, %v6579_v38  ;;  %v3271_v1 = vpop.f32.mrf.mxu1  ;;  %v3218_v0 = vpop.f32.mrf.mxu0 }
 0x141   :  { %3041 = vmatmul.mubr.msk.f32.gmra.mxu1 %vm66_vm11, %v6579_v38  ;;  %3028 = vmatprep.mubr.msk.f32.mxu0 %vm79_vm1, %v6579_v38  ;;  %v3272_v8 = vadd.f32 %v3271_v1, %v3270_v21  ;;  %v3219_v26 = vadd.f32 %v3218_v0, %v3217_v10 }
 0x142   :  { %3042 = vmatprep.mubr.msk.f32.mxu1 %vm71_vm13, %v6579_v38 }
 0x143   :  { %v6082_v42 = vadd.f32 %v3272_v8, %v915_v23  ;;  %v933_v3 = vadd.f32 %v3219_v26, %v5923_v7 }
 0x144   :  { %3029 = vmatmul.mubr.msk.f32.gmra.mxu0 %vm78_vm2, %v6579_v38  ;;  %v3220_v4 = vpop.f32.mrf.mxu0  ;;  %v3273_v20 = vpop.f32.mrf.mxu1 }
 0x145   :  { %3043 = vmatmul.mubr.msk.f32.gmra.mxu1 %vm70_vm14, %v6579_v38  ;;  %3030 = vmatprep.mubr.msk.f32.mxu0 %vm83_vm12, %v6579_v38 }
 0x146   :  { %3044 = vmatprep.mubr.msk.f32.mxu1 %vm75_vm4, %v6579_v38  ;;  %v3221_v61 = vpop.f32.mrf.mxu0  ;;  %v3274_v7 = vpop.f32.mrf.mxu1 }
 0x147   :  { %v3222_v19 = vadd.f32 %v3221_v61, %v3220_v4  ;;  %v3275_v15 = vadd.f32 %v3274_v7, %v3273_v20 }
 0x148   :  { %3031 = vmatmul.mubr.msk.f32.gmra.mxu0 %vm82_vm15, %v6579_v38 }
 0x149   :  { %3045 = vmatmul.mubr.msk.f32.gmra.mxu1 %vm74_vm0, %v6579_v38  ;;  %3032 = vmatprep.mubr.msk.f32.mxu0 %vm6933_vm6, %v6579_v38  ;;  %v942_v62 = vadd.f32 %v3222_v19, %v5941_v32  ;;  %v1112_v51 = vadd.f32 %v3275_v15, %v924_v24 }
 0x14a   :  { %3046 = vmatprep.mubr.msk.f32.mxu1 %vm79_vm1, %v6579_v38  ;;  %v3223_v49 = vpop.f32.mrf.mxu0  ;;  %v3276_v5 = vpop.f32.mrf.mxu1 }
 0x14c   :  { %3033 = vmatmul.mubr.msk.f32.gmra.mxu0 %vm6934_vm7, %v6579_v38  ;;  %v3224_v56 = vpop.f32.mrf.mxu0  ;;  %v3277_v39 = vpop.f32.mrf.mxu1 }
 0x14d   :  { %3047 = vmatmul.mubr.msk.f32.gmra.mxu1 %vm78_vm2, %v6579_v38  ;;  %v3225_v32 = vadd.f32 %v3224_v56, %v3223_v49  ;;  %v3278_v14 = vadd.f32 %v3277_v39, %v3276_v5 }
 0x14e   :  { %3048 = vmatprep.mubr.msk.f32.mxu1 %vm83_vm12, %v6579_v38 }
 0x14f   :  { %v951_v44 = vadd.f32 %v3225_v32, %v5961_v54  ;;  %v1123_v35 = vadd.f32 %v3278_v14, %v933_v3  ;;  %v3226_v18 = vpop.f32.mrf.mxu0 }
 0x150   :  { %v3279_v22 = vpop.f32.mrf.mxu1 }
 0x151   :  { %3049 = vmatmul.mubr.msk.f32.gmra.mxu1 %vm82_vm15, %v6579_v38  ;;  %v3227_v30 = vpop.f32.mrf.mxu0 }
 0x152   :  { %3050 = vmatprep.mubr.msk.f32.mxu1 %vm6935_vm8, %v6579_v38  ;;  %v3280_v43 = vpop.f32.mrf.mxu1  ;;  %v3228_v27 = vadd.f32 %v3227_v30, %v3226_v18 }
 0x153   :  { %v3281_v59 = vadd.f32 %v3280_v43, %v3279_v22 }
 0x154   :  { %v960_v54 = vadd.f32 %v3228_v27, %v5982_v31 }
 0x155   :  { %3051 = vmatmul.mubr.msk.f32.gmra.mxu1 %vm6936_vm9, %v6579_v38  ;;  %v1134_v45 = vadd.f32 %v3281_v59, %v942_v62  ;;  %v3282_v16 = vpop.f32.mrf.mxu1 }
 0x156   :  { %v3320_v60 = vpop.f32.mrf.mxu0 }
 0x157   :  { %v3283_v17 = vpop.f32.mrf.mxu1 }
 0x158   :  { %v3321_v28 = vpop.f32.mrf.mxu0  ;;  %v3284_v9 = vadd.f32 %v3283_v17, %v3282_v16 }
 0x159   :  { %v3322_v41 = vadd.f32 %v3321_v28, %v3320_v60  ;;  %v3285_v63 = vpop.f32.mrf.mxu1 }
 0x15a   :  { %v3323_v36 = vpop.f32.mrf.mxu0  ;;  %v1145_v53 = vadd.f32 %v3284_v9, %v951_v44 }
 0x15b   :  { %v1324_v11 = vadd.f32 %v3322_v41, %v6007_v13  ;;  %v3286_v33 = vpop.f32.mrf.mxu1 }
 0x15c   :  { %v3324_v58 = vpop.f32.mrf.mxu0  ;;  %v3287_v46 = vadd.f32 %v3286_v33, %v3285_v63 }
 0x15d   :  { %v3325_v23 = vadd.f32 %v3324_v58, %v3323_v36 }
 0x15e   :  { %v1156_v57 = vadd.f32 %v3287_v46, %v960_v54 }
 0x15f   :  { %v1331_v38 = vadd.f32 %v3325_v23, %v6033_v37  ;;  %v3379_v31 = vpop.f32.mrf.mxu1  ;;  %v3326_v47 = vpop.f32.mrf.mxu0 }
 0x161   :  { %v3380_v48 = vpop.f32.mrf.mxu1  ;;  %v3327_v6 = vpop.f32.mrf.mxu0 }
 0x162   :  { %v3381_v29 = vadd.f32 %v3380_v48, %v3379_v31  ;;  %v3328_v34 = vadd.f32 %v3327_v6, %v3326_v47 }
 0x164   :  { %v1484_v55 = vadd.f32 %v3381_v29, %v1324_v11  ;;  %v1338_v12 = vadd.f32 %v3328_v34, %v6064_v25  ;;  %v3329_v2 = vpop.f32.mrf.mxu0 }
 0x165   :  { %v3382_v24 = vpop.f32.mrf.mxu1 }
 0x166   :  { %v3330_v21 = vpop.f32.mrf.mxu0 }
 0x167   :  { %v3383_v13 = vpop.f32.mrf.mxu1  ;;  %v3331_v10 = vadd.f32 %v3330_v21, %v3329_v2 }
 0x168   :  { %v3384_v1 = vadd.f32 %v3383_v13, %v3382_v24 }
 0x169   :  { %v1345_v40 = vadd.f32 %v3331_v10, %v6082_v42 }
 0x16a   :  { %v1491_v0 = vadd.f32 %v3384_v1, %v1331_v38  ;;  %v3332_v8 = vpop.f32.mrf.mxu0 }
 0x16b   :  { %v3385_v37 = vpop.f32.mrf.mxu1 }
 0x16c   :  { %v3333_v26 = vpop.f32.mrf.mxu0 }
 0x16d   :  { %v3386_v3 = vpop.f32.mrf.mxu1  ;;  %v3334_v4 = vadd.f32 %v3333_v26, %v3332_v8 }
 0x16e   :  { %v3387_v50 = vadd.f32 %v3386_v3, %v3385_v37 }
 0x16f   :  { %v1352_v20 = vadd.f32 %v3334_v4, %v1112_v51 }
 0x170   :  { %v1498_v61 = vadd.f32 %v3387_v50, %v1338_v12  ;;  %v3388_v19 = vpop.f32.mrf.mxu1  ;;  %v3335_v7 = vpop.f32.mrf.mxu0 }
 0x172   :  { %v3389_v25 = vpop.f32.mrf.mxu1  ;;  %v3336_v15 = vpop.f32.mrf.mxu0 }
 0x173   :  { %v3390_v52 = vadd.f32 %v3389_v25, %v3388_v19  ;;  %v3337_v62 = vadd.f32 %v3336_v15, %v3335_v7 }
 0x175   :  { %v1505_v49 = vadd.f32 %v3390_v52, %v1345_v40  ;;  %v1359_v5 = vadd.f32 %v3337_v62, %v1123_v35 }
 0x176   :  { %v3338_v56 = vpop.f32.mrf.mxu0  ;;  %v3391_v32 = vpop.f32.mrf.mxu1 }
 0x178   :  { %v3339_v42 = vpop.f32.mrf.mxu0  ;;  %v3392_v14 = vpop.f32.mrf.mxu1 }
 0x179   :  { %v3340_v39 = vadd.f32 %v3339_v42, %v3338_v56  ;;  %v3393_v44 = vadd.f32 %v3392_v14, %v3391_v32 }
 0x17b   :  { %v1366_v18 = vadd.f32 %v3340_v39, %v1134_v45  ;;  %v1512_v22 = vadd.f32 %v3393_v44, %v1352_v20 }
 0x17c   :  { %v3341_v30 = vpop.f32.mrf.mxu0  ;;  %v3394_v43 = vpop.f32.mrf.mxu1 }
 0x17e   :  { %v3342_v51 = vpop.f32.mrf.mxu0  ;;  %v3395_v59 = vpop.f32.mrf.mxu1 }
 0x17f   :  { %v3343_v27 = vadd.f32 %v3342_v51, %v3341_v30  ;;  %v3396_v54 = vadd.f32 %v3395_v59, %v3394_v43 }
 0x181   :  { %v1373_v16 = vadd.f32 %v3343_v27, %v1145_v53  ;;  %v1519_v60 = vadd.f32 %v3396_v54, %v1359_v5  ;;  %v3344_v17 = vpop.f32.mrf.mxu0 }
 0x182   :  { %v3397_v28 = vpop.f32.mrf.mxu1 }
 0x183   :  { %v3345_v9 = vpop.f32.mrf.mxu0 }
 0x184   :  { %v3398_v35 = vpop.f32.mrf.mxu1  ;;  %v3346_v41 = vadd.f32 %v3345_v9, %v3344_v17 }
 0x185   :  { %v3399_v63 = vadd.f32 %v3398_v35, %v3397_v28 }
 0x186   :  { %v1380_v36 = vadd.f32 %v3346_v41, %v1156_v57 }
 0x187   :  { %v1526_v11 = vadd.f32 %v3399_v63, %v1366_v18 }
 0x188   :  { %v3400_v33 = vpop.f32.mrf.mxu1  ;;  %v3438_v58 = vpop.f32.mrf.mxu0 }
 0x18a   :  { %v3401_v45 = vpop.f32.mrf.mxu1  ;;  %v3439_v46 = vpop.f32.mrf.mxu0 }
 0x18b   :  { %v3402_v23 = vadd.f32 %v3401_v45, %v3400_v33  ;;  %v3440_v38 = vadd.f32 %v3439_v46, %v3438_v58 }
 0x18c   :  { %v3403_v31 = vpop.f32.mrf.mxu1  ;;  %v3441_v47 = vpop.f32.mrf.mxu0 }
 0x18d   :  { %v1533_v48 = vadd.f32 %v3402_v23, %v1373_v16  ;;  %v1652_v6 = vadd.f32 %v3440_v38, %v1484_v55 }
 0x18e   :  { %v3404_v53 = vpop.f32.mrf.mxu1  ;;  %v3442_v29 = vpop.f32.mrf.mxu0 }
 0x18f   :  { %v3405_v34 = vadd.f32 %v3404_v53, %v3403_v31  ;;  %v3443_v12 = vadd.f32 %v3442_v29, %v3441_v47 }
 0x191   :  { %v1540_v2 = vadd.f32 %v3405_v34, %v1380_v36  ;;  %v1667_v24 = vadd.f32 %v3443_v12, %v1491_v0  ;;  %v3497_v21 = vpop.f32.mrf.mxu1 }
 0x192   :  { %v3444_v13 = vpop.f32.mrf.mxu0 }
 0x193   :  { %v3498_v57 = vpop.f32.mrf.mxu1 }
 0x194   :  { %v3445_v10 = vpop.f32.mrf.mxu0  ;;  %v3499_v1 = vadd.f32 %v3498_v57, %v3497_v21 }
 0x195   :  { %v3446_v40 = vadd.f32 %v3445_v10, %v3444_v13 }
 0x196   :  { %v6148_v8 = vadd.f32 %v3499_v1, %v1652_v6 }
 0x197   :  { %v1682_v37 = vadd.f32 %v3446_v40, %v1498_v61  ;;  %v3447_v26 = vpop.f32.mrf.mxu0  ;;  %v3500_v3 = vpop.f32.mrf.mxu1 }
 0x199   :  { %v3448_v4 = vpop.f32.mrf.mxu0  ;;  %v3501_v50 = vpop.f32.mrf.mxu1 }
 0x19a   :  { %v3449_v55 = vadd.f32 %v3448_v4, %v3447_v26  ;;  %v3502_v20 = vadd.f32 %v3501_v50, %v3500_v3 }
 0x19c   :  { %v1697_v19 = vadd.f32 %v3449_v55, %v1505_v49  ;;  %v6150_v7 = vadd.f32 %v3502_v20, %v1667_v24 }
 0x19d   :  { %v3450_v25 = vpop.f32.mrf.mxu0  ;;  %v3503_v0 = vpop.f32.mrf.mxu1 }
 0x19f   :  { %v3451_v15 = vpop.f32.mrf.mxu0  ;;  %v3504_v52 = vpop.f32.mrf.mxu1 }
 0x1a0   :  { %v3452_v62 = vadd.f32 %v3451_v15, %v3450_v25  ;;  %v3505_v5 = vadd.f32 %v3504_v52, %v3503_v0 }
 0x1a2   :  { %v1712_v56 = vadd.f32 %v3452_v62, %v1512_v22  ;;  %v6152_v32 = vadd.f32 %v3505_v5, %v1682_v37  ;;  %v3506_v42 = vpop.f32.mrf.mxu1 }
 0x1a3   :  { %v3453_v61 = vpop.f32.mrf.mxu0 }
 0x1a4   :  { %v3507_v39 = vpop.f32.mrf.mxu1 }
 0x1a5   :  { %v3454_v14 = vpop.f32.mrf.mxu0  ;;  %v3508_v44 = vadd.f32 %v3507_v39, %v3506_v42 }
 0x1a6   :  { %v3455_v18 = vadd.f32 %v3454_v14, %v3453_v61 }
 0x1a7   :  { %v6154_v30 = vadd.f32 %v3508_v44, %v1697_v19 }
 0x1a8   :  { %v1727_v49 = vadd.f32 %v3455_v18, %v1519_v60  ;;  %v3456_v43 = vpop.f32.mrf.mxu0 }
 0x1a9   :  { %v3509_v51 = vpop.f32.mrf.mxu1 }
 0x1aa   :  { %v3457_v27 = vpop.f32.mrf.mxu0 }
 0x1ab   :  { %v3458_v59 = vadd.f32 %v3457_v27, %v3456_v43  ;;  %v3510_v54 = vpop.f32.mrf.mxu1 }
 0x1ac   :  { %v3511_v16 = vadd.f32 %v3510_v54, %v3509_v51 }
 0x1ad   :  { %v1742_v17 = vadd.f32 %v3458_v59, %v1526_v11 }
 0x1ae   :  { %v6156_v28 = vadd.f32 %v3511_v16, %v1712_v56  ;;  %v3459_v22 = vpop.f32.mrf.mxu0 }
 0x1af   :  { %v3512_v9 = vpop.f32.mrf.mxu1 }
 0x1b0   :  { %v3460_v35 = vpop.f32.mrf.mxu0 }
 0x1b1   :  { %v3461_v41 = vadd.f32 %v3460_v35, %v3459_v22  ;;  %v3513_v63 = vpop.f32.mrf.mxu1 }
 0x1b2   :  { %v3514_v36 = vadd.f32 %v3513_v63, %v3512_v9 }
 0x1b3   :  { %v1757_v33 = vadd.f32 %v3461_v41, %v1533_v48 }
 0x1b4   :  { %v6158_v58 = vadd.f32 %v3514_v36, %v1727_v49  ;;  %v3462_v45 = vpop.f32.mrf.mxu0  ;;  %v3515_v60 = vpop.f32.mrf.mxu1 }
 0x1b6   :  { %v3463_v46 = vpop.f32.mrf.mxu0  ;;  %v3516_v23 = vpop.f32.mrf.mxu1 }
 0x1b7   :  { %v3464_v38 = vadd.f32 %v3463_v46, %v3462_v45  ;;  %v3517_v31 = vadd.f32 %v3516_v23, %v3515_v60 }
 0x1b9   :  { %v1772_v47 = vadd.f32 %v3464_v38, %v1540_v2  ;;  %v6160_v6 = vadd.f32 %v3517_v31, %v1742_v17 }
 0x1ba   :  { %v3518_v11 = vpop.f32.mrf.mxu1  ;;  %v3556_v53 = vpop.f32.mrf.mxu0 }
 0x1bc   :  { %v3519_v29 = vpop.f32.mrf.mxu1  ;;  %v3557_v34 = vpop.f32.mrf.mxu0 }
 0x1bd   :  { %v3520_v12 = vadd.f32 %v3519_v29, %v3518_v11  ;;  %v3558_v9 = vadd.f32 %v3557_v34, %v3556_v53 }
 0x1be   :  { %v3521_v24 = vpop.f32.mrf.mxu1  ;;  %v3559_v21 = vpop.f32.mrf.mxu0 }
 0x1bf   :  { %v6162_v13 = vadd.f32 %v3520_v12, %v1757_v33  ;;  %v2198_v60 = vadd.f32 %v3558_v9, %v6148_v8 }
 0x1c0   :  { %v3522_v48 = vpop.f32.mrf.mxu1  ;;  %v3560_v57 = vpop.f32.mrf.mxu0 }
 0x1c1   :  { %v3523_v10 = vadd.f32 %v3522_v48, %v3521_v24  ;;  %v3561_v45 = vadd.f32 %v3560_v57, %v3559_v21 }
 0x1c3   :  { %v6164_v1 = vadd.f32 %v3523_v10, %v1772_v47  ;;  %v3615_v40 = vpop.f32.mrf.mxu1  ;;  %v2207_v29 = vadd.f32 %v3561_v45, %v6150_v7 }
 0x1c4   :  { %v3562_v37 = vpop.f32.mrf.mxu0 }
 0x1c5   :  { %6937 = vst [vmem:[#allocation32_spill] sm:$0xff] %v6164_v1  ;;  %v3616_v26 = vpop.f32.mrf.mxu1 }
 0x1c6   :  { %v3563_v2 = vpop.f32.mrf.mxu0  ;;  %v3617_v63 = vadd.f32 %v3616_v26, %v3615_v40 }
 0x1c7   :  { %v3564_v53 = vadd.f32 %v3563_v2, %v3562_v37 }
 0x1c8   :  { %v2378_v31 = vadd.f32 %v3617_v63, %v2198_v60 }
 0x1c9   :  { %v3565_v3 = vpop.f32.mrf.mxu0  ;;  %v3618_v4 = vpop.f32.mrf.mxu1 }
 0x1cb   :  { %v3566_v50 = vpop.f32.mrf.mxu0  ;;  %v3619_v55 = vpop.f32.mrf.mxu1 }
 0x1cc   :  { %v3620_v47 = vadd.f32 %v3619_v55, %v3618_v4  ;;  %v3567_v8 = vadd.f32 %v3566_v50, %v3565_v3 }
 0x1ce   :  { %v2389_v26 = vadd.f32 %v3620_v47, %v2207_v29  ;;  %v2225_v45 = vadd.f32 %v3567_v8, %v6154_v30 }
 0x1cf   :  { %v6166_v20 = vpop.f32.mrf.mxu0  ;;  %v3621_v19 = vpop.f32.mrf.mxu1 }
 0x1d1   :  { %v6168_v25 = vpop.f32.mrf.mxu0  ;;  %v3622_v0 = vpop.f32.mrf.mxu1 }
 0x1d2   :  { %v3623_v1 = vadd.f32 %v3622_v0, %v3621_v19  ;;  %v3570_v19 = vadd.f32 %v6168_v25, %v6166_v20 }
 0x1d4   :  { %v3624_v15 = vpop.f32.mrf.mxu1  ;;  %v2234_v30 = vadd.f32 %v3570_v19, %v6156_v28 }
 0x1d5   :  { %v6170_v52 = vpop.f32.mrf.mxu0 }
 0x1d6   :  { %v3625_v5 = vpop.f32.mrf.mxu1 }
 0x1d7   :  { %v6172_v62 = vpop.f32.mrf.mxu0  ;;  %v3626_v2 = vadd.f32 %v3625_v5, %v3624_v15 }
 0x1d8   :  { %v3573_v15 = vadd.f32 %v6172_v62, %v6170_v52 }
 0x1da   :  { %v6174_v56 = vpop.f32.mrf.mxu0 }
 0x1db   :  { %v6176_v42 = vpop.f32.mrf.mxu1 }
 0x1dc   :  { %v6178_v61 = vpop.f32.mrf.mxu0 }
 0x1dd   :  { %v3628_v39 = vpop.f32.mrf.mxu1  ;;  %v3576_v52 = vadd.f32 %v6178_v61, %v6174_v56 }
 0x1df   :  { %v2252_v8 = vadd.f32 %v3576_v52, %v6160_v6 }
 0x1e0   :  { %v6180_v14 = vpop.f32.mrf.mxu0 }
 0x1e1   :  { %v6182_v44 = vpop.f32.mrf.mxu1 }
 0x1e2   :  { %v6184_v18 = vpop.f32.mrf.mxu0 }
 0x1e3   :  { %v6186_v49 = vpop.f32.mrf.mxu1 }
 0x1e6   :  { %v6188_v43 = vpop.f32.mrf.mxu0  ;;  %v6190_v51 = vpop.f32.mrf.mxu1 }
 0x1e8   :  { %v6192_v27 = vpop.f32.mrf.mxu0  ;;  %v6194_v59 = vpop.f32.mrf.mxu1 }
 0x1ec   :  { %v6196_v54 = vpop.f32.mrf.mxu1  ;;  %v3674_v16 = vpop.f32.mrf.mxu0 }
 0x1ee   :  { %v6198_v17 = vpop.f32.mrf.mxu1  ;;  %v3675_v22 = vpop.f32.mrf.mxu0 }
 0x1ef   :  { %v3676_v46 = vadd.f32 %v3675_v22, %v3674_v16  ;;  %v2216_v22 = vadd.f32 %v3564_v53, %v6152_v32  ;;  %v3632_v53 = vadd.f32 %v6186_v49, %v6182_v44  ;;  %v3579_v49 = vadd.f32 %v6184_v18, %v6180_v14 }
 0x1f0   :  { %v6200_v35 = vpop.f32.mrf.mxu1  ;;  %v3677_v41 = vpop.f32.mrf.mxu0  ;;  %v3582_v14 = vadd.f32 %v6192_v27, %v6188_v43 }
 0x1f1   :  { %v2634_v34 = vadd.f32 %v3676_v46, %v2378_v31  ;;  %v2400_v37 = vadd.f32 %v3623_v1, %v2216_v22 }
 0x1f2   :  { %v6202_v36 = vpop.f32.mrf.mxu1  ;;  %v3678_v33 = vpop.f32.mrf.mxu0 }
 0x1f3   :  { %v3679_v24 = vadd.f32 %v3678_v33, %v3677_v41 }
 0x1f4   :  { %v3680_v23 = vpop.f32.mrf.mxu0 }
 0x1f5   :  { %v3733_v38 = vpop.f32.mrf.mxu1  ;;  %v2641_v9 = vadd.f32 %v3679_v24, %v2389_v26 }
 0x1f6   :  { %v3681_v11 = vpop.f32.mrf.mxu0 }
 0x1f7   :  { %v3734_v12 = vpop.f32.mrf.mxu1  ;;  %v3682_v4 = vadd.f32 %v3681_v11, %v3680_v23  ;;  %v2411_v23 = vadd.f32 %v3626_v2, %v2225_v45 }
 0x1f8   :  { %v3735_v48 = vadd.f32 %v3734_v12, %v3733_v38  ;;  %v3683_v10 = vpop.f32.mrf.mxu0  ;;  %v3629_v38 = vadd.f32 %v3628_v39, %v6176_v42  ;;  %v2243_v39 = vadd.f32 %v3573_v15, %v6158_v58 }
 0x1f9   :  { %v3736_v40 = vpop.f32.mrf.mxu1  ;;  %v2648_v3 = vadd.f32 %v3682_v4, %v2400_v37 }
 0x1fa   :  { %v2794_v21 = vadd.f32 %v3735_v48, %v2634_v34  ;;  %v3684_v57 = vpop.f32.mrf.mxu0  ;;  %v2422_v12 = vadd.f32 %v3629_v38, %v2234_v30  ;;  %v2433_v26 = vadd.f32 %v3632_v53, %v2243_v39 }
 0x1fb   :  { %v3737_v16 = vpop.f32.mrf.mxu1  ;;  %v3685_v50 = vadd.f32 %v3684_v57, %v3683_v10 }
 0x1fc   :  { %2883 = vst [vmem:[#allocation3] sm:$0xff] %v2794_v21  ;;  %v3738_v55 = vadd.f32 %v3737_v16, %v3736_v40  ;;  %v3686_v7 = vpop.f32.mrf.mxu0  ;;  %v3635_v21 = vadd.f32 %v6194_v59, %v6190_v51  ;;  %v2261_v51 = vadd.f32 %v3579_v49, %v6162_v13 }
 0x1fd   :  { %v3739_v63 = vpop.f32.mrf.mxu1  ;;  %v2655_v47 = vadd.f32 %v3685_v50, %v2411_v23 }
 0x1fe   :  { %v2801_v41 = vadd.f32 %v3738_v55, %v2641_v9  ;;  %v3687_v33 = vpop.f32.mrf.mxu0  ;;  %v2444_v4 = vadd.f32 %v3635_v21, %v2252_v8  ;;  %v3638_v55 = vadd.f32 %v6198_v17, %v6196_v54  ;;  %v6938_v54 = vld [vmem:[#allocation32_spill] sm:$0xff] }
 0x1ff   :  { %v3740_v60 = vpop.f32.mrf.mxu1  ;;  %v3688_v11 = vadd.f32 %v3687_v33, %v3686_v7  ;;  %v3641_v33 = vadd.f32 %v6202_v36, %v6200_v35  ;;  %v2270_v17 = vadd.f32 %v3582_v14, %v6938_v54 }
 0x200   :  { %2884 = vst [vmem:[#allocation3 + $0x8] sm:$0xff] %v2801_v41  ;;  %v3741_v32 = vadd.f32 %v3740_v60, %v3739_v63  ;;  %v3689_v0 = vpop.f32.mrf.mxu0  ;;  %v2455_v41 = vadd.f32 %v3638_v55, %v2261_v51 }
 0x201   :  { %v3742_v46 = vpop.f32.mrf.mxu1  ;;  %v2662_v62 = vadd.f32 %v3688_v11, %v2422_v12  ;;  %v2466_v43 = vadd.f32 %v3641_v33, %v2270_v17 }
 0x202   :  { %v2808_v31 = vadd.f32 %v3741_v32, %v2648_v3  ;;  %v3690_v1 = vpop.f32.mrf.mxu0 }
 0x203   :  { %v3743_v5 = vpop.f32.mrf.mxu1  ;;  %v3691_v28 = vadd.f32 %v3690_v1, %v3689_v0 }
 0x204   :  { %2885 = vst [vmem:[#allocation3 + $0x10] sm:$0xff] %v2808_v31  ;;  %v3744_v20 = vadd.f32 %v3743_v5, %v3742_v46  ;;  %v3692_v25 = vpop.f32.mrf.mxu0 }
 0x205   :  { %v3745_v29 = vpop.f32.mrf.mxu1  ;;  %v2669_v16 = vadd.f32 %v3691_v28, %v2433_v26 }
 0x206   :  { %v2815_v34 = vadd.f32 %v3744_v20, %v2655_v47  ;;  %v3693_v42 = vpop.f32.mrf.mxu0 }
 0x207   :  { %v3746_v24 = vpop.f32.mrf.mxu1  ;;  %v3694_v56 = vadd.f32 %v3693_v42, %v3692_v25 }
 0x208   :  { %2886 = vst [vmem:[#allocation3 + $0x18] sm:$0xff] %v2815_v34  ;;  %v3747_v48 = vadd.f32 %v3746_v24, %v3745_v29  ;;  %v3695_v10 = vpop.f32.mrf.mxu0 }
 0x209   :  { %v3748_v40 = vpop.f32.mrf.mxu1  ;;  %v2676_v18 = vadd.f32 %v3694_v56, %v2444_v4 }
 0x20a   :  { %v2822_v57 = vadd.f32 %v3747_v48, %v2662_v62  ;;  %v3696_v44 = vpop.f32.mrf.mxu0 }
 0x20b   :  { %v3749_v58 = vpop.f32.mrf.mxu1  ;;  %v3697_v63 = vadd.f32 %v3696_v44, %v3695_v10 }
 0x20c   :  { %2887 = vst [vmem:[#allocation3 + $0x20] sm:$0xff] %v2822_v57  ;;  %v3750_v61 = vadd.f32 %v3749_v58, %v3748_v40  ;;  %v3698_v22 = vpop.f32.mrf.mxu0 }
 0x20d   :  { %v3751_v9 = vpop.f32.mrf.mxu1  ;;  %v2683_v19 = vadd.f32 %v3697_v63, %v2455_v41 }
 0x20e   :  { %v2829_v7 = vadd.f32 %v3750_v61, %v2669_v16  ;;  %v3699_v37 = vpop.f32.mrf.mxu0 }
 0x20f   :  { %v3752_v59 = vpop.f32.mrf.mxu1  ;;  %v3700_v13 = vadd.f32 %v3699_v37, %v3698_v22 }
 0x210   :  { %2888 = vst [vmem:[#allocation3 + $0x28] sm:$0xff] %v2829_v7  ;;  %v3753_v6 = vadd.f32 %v3752_v59, %v3751_v9 }
 0x211   :  { %v3754_v2 = vpop.f32.mrf.mxu1  ;;  %v2690_v0 = vadd.f32 %v3700_v13, %v2466_v43 }
 0x212   :  { %v2836_v45 = vadd.f32 %v3753_v6, %v2676_v18 }
 0x213   :  { %v3755_v60 = vpop.f32.mrf.mxu1 }
 0x214   :  { %2889 = vst [vmem:[#allocation3 + $0x30] sm:$0xff] %v2836_v45  ;;  %v3756_v3 = vadd.f32 %v3755_v60, %v3754_v2 }
 0x215   :  { %v3757_v50 = vpop.f32.mrf.mxu1 }
 0x216   :  { %v2843_v27 = vadd.f32 %v3756_v3, %v2683_v19 }
 0x217   :  { %v3758_v32 = vpop.f32.mrf.mxu1 }
 0x218   :  { %2890 = vst [vmem:[#allocation3 + $0x38] sm:$0xff] %v2843_v27  ;;  %v3759_v46 = vadd.f32 %v3758_v32, %v3757_v50 }
 0x21a   :  { %v2850_v23 = vadd.f32 %v3759_v46, %v2690_v0 }
 0x21c   :  { %2891 = vst [vmem:[#allocation3 + $0x40] sm:$0xff] %v2850_v23 }
 0x21d   :  { %3777 = shalt.err (!%p3774_p4)
}
 0x21e   :  { %s3791_s30 = smov 128   ;;  %s3792_s3 = smov 8  }
 0x21f   :  { %2903 = dma.vmem_to_hbm [thread:$0]  %s2898_s28, 1152, %s6237_s2, [#allocation4], %s3791_s30, %s3791_s30, %s3792_s3  }
 0x220   :  { %3786 = dma.done.wait [#allocation4], 1152  }
 0x221   :  { %3787 = vsyncadd [#allocation4], 4294966144 }
 0x222   :  { %2907 = vsyncpa [#allocation4], 1 }

</bundles_post_ra>
